<compile_context>
chip_gen: v5e
topology: v5e:2x2
jax: 0.10.0
libtpu: 0.0.40
codegen_flags: <defaults>
</compile_context>

<pallas_src>
import math
import functools

import jax
import jax.numpy as jnp
from jax.experimental import pallas as pl
from jax.experimental.pallas import tpu as pltpu


def _cross_attention_kernel(
    x_ref, y_ref,
    wq_ref, bq_ref,
    wkv_ref, bkv_ref,
    wo_ref, bo_ref,
    o_ref,
    *, n_heads: int, d_head: int,
):
    # x_ref: (1, Sq, d_embed), y_ref: (1, Skv, d_cross) -- one batch element.
    x = x_ref[0]                              # (Sq, d_embed), input dtype
    y = y_ref[0]                              # (Skv, d_cross)
    sq = x.shape[0]
    skv = y.shape[0]
    d_embed = n_heads * d_head
    in_dt = x.dtype

    # Projections: weights are pre-transposed in the wrapper; 1/sqrt(d_head) is
    # already folded into wq/bq. MXU accumulates in f32; biases are f32.
    q = jnp.dot(x, wq_ref[...], preferred_element_type=jnp.float32) + bq_ref[...]
    # Fused K/V projection on the shared context input.
    kv = jnp.dot(y, wkv_ref[...], preferred_element_type=jnp.float32) + bkv_ref[...]
    k = kv[:, :d_embed]
    v = kv[:, d_embed:]

    # Split heads: (S, d_embed) -> (n_heads, S, d_head); matmul operands stay in
    # the input dtype so bf16 inputs get native bf16 MXU throughput.
    q3 = jnp.transpose(q.astype(in_dt).reshape(sq, n_heads, d_head), (1, 0, 2))
    k3 = jnp.transpose(k.astype(in_dt).reshape(skv, n_heads, d_head), (1, 0, 2))
    v3 = jnp.transpose(v.astype(in_dt).reshape(skv, n_heads, d_head), (1, 0, 2))

    # Batched-over-heads scaled dot-product attention; softmax math in f32.
    s = jnp.einsum("hqd,hkd->hqk", q3, k3, preferred_element_type=jnp.float32)
    s = s - jnp.max(s, axis=-1, keepdims=True)
    p = jnp.exp(s)
    p = p * pl.reciprocal(jnp.sum(p, axis=-1, keepdims=True), approx=True)

    attn = jnp.einsum("hqk,hkd->hqd", p.astype(in_dt), v3,
                      preferred_element_type=jnp.float32)

    # Merge heads into one lane-dense (Sq, d_embed) slab, then project out.
    attn = jnp.transpose(attn.astype(in_dt), (1, 0, 2)).reshape(sq, d_embed)
    out = jnp.dot(attn, wo_ref[...], preferred_element_type=jnp.float32) + bo_ref[...]
    o_ref[0] = out.astype(o_ref.dtype)


def cross_attention(x, y, params, *, n_heads: int):
    """x: (B, Sq, d_embed), y: (B, Skv, d_cross). Returns (B, Sq, d_embed)."""
    B, Sq, d_embed = x.shape
    _, Skv, d_cross = y.shape
    assert d_embed % n_heads == 0
    d_head = d_embed // n_heads
    scale = 1.0 / math.sqrt(d_head)

    wq, bq, wk, bk, wv, bv, wo, bo = params
    wdt = x.dtype

    # Pre-transpose once in the wrapper (one XLA op, not once per grid step),
    # fold the softmax scale into the q projection, and pack K/V weights into a
    # single fused projection. Weights in the input dtype; biases kept in f32
    # (added after the f32-accumulated matmul).
    wq_t = (wq.T * scale).astype(wdt)                                   # (d_embed, d_embed)
    wkv_t = jnp.concatenate([wk.T, wv.T], axis=1).astype(wdt)           # (d_cross, 2*d_embed)
    wo_t = wo.T.astype(wdt)                                             # (d_embed, d_embed)
    bq2 = (bq * scale).reshape(1, d_embed).astype(jnp.float32)
    bkv2 = jnp.concatenate([bk, bv]).reshape(1, 2 * d_embed).astype(jnp.float32)
    bo2 = bo.reshape(1, d_embed).astype(jnp.float32)

    # Explicit VMEM budget sized to the actual buffers (kept under the 64 MiB
    # v7x ceiling): double-buffered activation tiles + resident weights + f32
    # intermediates.
    elt = jnp.dtype(wdt).itemsize
    act = (2 * Sq * d_embed + Skv * d_cross) * elt
    wts = (2 * d_embed * d_embed + 2 * d_cross * d_embed) * elt + 4 * d_embed * 4
    tmp = (3 * Sq * d_embed + 4 * Skv * d_embed
           + 2 * n_heads * Sq * Skv + 2 * Sq * d_embed) * 4
    vmem_limit = int(min(max(2 * (act + wts) + tmp + (2 << 20), 8 << 20), 64 << 20))

    kernel = functools.partial(
        _cross_attention_kernel, n_heads=n_heads, d_head=d_head
    )

    full = lambda shape: pl.BlockSpec(shape, lambda b: (0,) * len(shape))

    return pl.pallas_call(
        kernel,
        out_shape=jax.ShapeDtypeStruct((B, Sq, d_embed), x.dtype),
        grid=(B,),
        in_specs=[
            pl.BlockSpec((1, Sq, d_embed), lambda b: (b, 0, 0)),   # x
            pl.BlockSpec((1, Skv, d_cross), lambda b: (b, 0, 0)),  # y
            full((d_embed, d_embed)),        # wq_t (scaled)
            full((1, d_embed)),              # bq (scaled)
            full((d_cross, 2 * d_embed)),    # wkv_t (fused K/V)
            full((1, 2 * d_embed)),          # bkv
            full((d_embed, d_embed)),        # wo_t
            full((1, d_embed)),              # bo
        ],
        out_specs=pl.BlockSpec((1, Sq, d_embed), lambda b: (b, 0, 0)),
        compiler_params=pltpu.CompilerParams(
            dimension_semantics=("parallel",),
            vmem_limit_bytes=vmem_limit,
        ),
    )(x, y, wq_t, bq2, wkv_t, bkv2, wo_t, bo2)


def cross_attention_reference(x, y, params, *, n_heads: int):
    """Pure-JAX reference mirroring the PyTorch forward."""
    wq, bq, wk, bk, wv, bv, wo, bo = params
    B, Sq, d_embed = x.shape
    d_head = d_embed // n_heads

    q = x @ wq.T + bq
    k = y @ wk.T + bk
    v = y @ wv.T + bv

    def split(t):
        Bq, S, _ = t.shape
        return t.reshape(Bq, S, n_heads, d_head).transpose(0, 2, 1, 3)

    qh, kh, vh = split(q), split(k), split(v)
    w = jnp.einsum("bhqd,bhkd->bhqk", qh, kh) / math.sqrt(d_head)
    w = jax.nn.softmax(w, axis=-1)
    o = jnp.einsum("bhqk,bhkd->bhqd", w, vh)
    o = o.transpose(0, 2, 1, 3).reshape(B, Sq, d_embed)
    return o @ wo.T + bo


def init_params(key, d_embed, d_cross):
    ks = jax.random.split(key, 8)
    def lin(kw, kb, out_f, in_f):
        bound = 1.0 / math.sqrt(in_f)
        w = jax.random.uniform(kw, (out_f, in_f), jnp.float32, -bound, bound)
        b = jax.random.uniform(kb, (out_f,), jnp.float32, -bound, bound)
        return w, b
    wq, bq = lin(ks[0], ks[1], d_embed, d_embed)
    wk, bk = lin(ks[2], ks[3], d_embed, d_cross)
    wv, bv = lin(ks[4], ks[5], d_embed, d_cross)
    wo, bo = lin(ks[6], ks[7], d_embed, d_embed)
    return (wq, bq, wk, bk, wv, bv, wo, bo)


if __name__ == "__main__":
    B, Sq, Skv = 2, 16, 8
    d_embed, d_cross, n_heads = 256, 96, 2   # d_head = 128 (lane-aligned heads)

    root = jax.random.PRNGKey(0)
    kx, ky, kp = jax.random.split(root, 3)
    x = jax.random.normal(kx, (B, Sq, d_embed), jnp.float32)
    y = jax.random.normal(ky, (B, Skv, d_cross), jnp.float32)
    params = init_params(kp, d_embed, d_cross)

    out = cross_attention(x, y, params, n_heads=n_heads)
    out = jax.block_until_ready(out)

    ref = cross_attention_reference(x, y, params, n_heads=n_heads)
    assert out.shape == (B, Sq, d_embed)
    max_err = float(jnp.max(jnp.abs(out - ref)))
    # Tolerance covers default (bf16-pass) MXU matmul precision + approx
    # reciprocal; a structural bug would be orders of magnitude larger.
    assert jnp.allclose(out, ref, atol=5e-3, rtol=5e-3), (
        f"mismatch vs reference (max abs err {max_err})")

    print("KERNEL_OK")
</pallas_src>

<mosaic_0001>
module attributes {stable_mosaic.version = 11 : i64} {
  func.func @_cross_attention_kernel(%arg0: i32, %arg1: memref<1x16x256xf32, #tpu.memory_space<vmem>>, %arg2: memref<1x8x96xf32, #tpu.memory_space<vmem>>, %arg3: memref<256x256xf32, #tpu.memory_space<vmem>>, %arg4: memref<1x256xf32, #tpu.memory_space<vmem>>, %arg5: memref<96x512xf32, #tpu.memory_space<vmem>>, %arg6: memref<1x512xf32, #tpu.memory_space<vmem>>, %arg7: memref<256x256xf32, #tpu.memory_space<vmem>>, %arg8: memref<1x256xf32, #tpu.memory_space<vmem>>, %arg9: memref<1x16x256xf32, #tpu.memory_space<vmem>>) attributes {dimension_semantics = [#tpu.dimension_semantics<parallel>], iteration_bounds = array<i64: 2>, scalar_prefetch = 0 : i64, scratch_operands = 0 : i64, tpu.core_type = #tpu.core_type<tc>, window_params = [{transform_indices = @transform_0, window_bounds = array<i64: 1, 16, 256>}, {transform_indices = @transform_1, window_bounds = array<i64: 1, 8, 96>}, {pipeline_mode = #tpu.pipeline_mode<synchronous>, transform_indices = @transform_2, window_bounds = array<i64: 256, 256>}, {pipeline_mode = #tpu.pipeline_mode<synchronous>, transform_indices = @transform_3, window_bounds = array<i64: 1, 256>}, {pipeline_mode = #tpu.pipeline_mode<synchronous>, transform_indices = @transform_4, window_bounds = array<i64: 96, 512>}, {pipeline_mode = #tpu.pipeline_mode<synchronous>, transform_indices = @transform_5, window_bounds = array<i64: 1, 512>}, {pipeline_mode = #tpu.pipeline_mode<synchronous>, transform_indices = @transform_6, window_bounds = array<i64: 256, 256>}, {pipeline_mode = #tpu.pipeline_mode<synchronous>, transform_indices = @transform_7, window_bounds = array<i64: 1, 256>}, {transform_indices = @transform_8, window_bounds = array<i64: 1, 16, 256>}]} {
    %c0 = arith.constant 0 : index
    %c0_0 = arith.constant 0 : index
    %c0_1 = arith.constant 0 : index
    %0 = vector.load %arg1[%c0, %c0_0, %c0_1] : memref<1x16x256xf32, #tpu.memory_space<vmem>>, vector<1x16x256xf32>
    %1 = vector.shape_cast %0 : vector<1x16x256xf32> to vector<16x256xf32>
    %c0_2 = arith.constant 0 : index
    %c0_3 = arith.constant 0 : index
    %c0_4 = arith.constant 0 : index
    %2 = vector.load %arg2[%c0_2, %c0_3, %c0_4] : memref<1x8x96xf32, #tpu.memory_space<vmem>>, vector<1x8x96xf32>
    %3 = vector.shape_cast %2 : vector<1x8x96xf32> to vector<8x96xf32>
    %c0_5 = arith.constant 0 : index
    %c0_6 = arith.constant 0 : index
    %4 = vector.load %arg3[%c0_5, %c0_6] : memref<256x256xf32, #tpu.memory_space<vmem>>, vector<256x256xf32>
    %cst = arith.constant dense<0.000000e+00> : vector<16x256xf32>
    %5 = tpu.matmul %1, %4, %cst {dimension_numbers = #tpu.dot_dimension_numbers<[1], [0], [0], [1], [0, 0, 1, 1], [], []>} : vector<16x256xf32>, vector<256x256xf32>, vector<16x256xf32> -> vector<16x256xf32>
    %c0_7 = arith.constant 0 : index
    %c0_8 = arith.constant 0 : index
    %6 = vector.load %arg4[%c0_7, %c0_8] : memref<1x256xf32, #tpu.memory_space<vmem>>, vector<1x256xf32>
    %7 = vector.broadcast %6 : vector<1x256xf32> to vector<16x256xf32>
    %8 = arith.addf %5, %7 : vector<16x256xf32>
    %c0_9 = arith.constant 0 : index
    %c0_10 = arith.constant 0 : index
    %9 = vector.load %arg5[%c0_9, %c0_10] : memref<96x512xf32, #tpu.memory_space<vmem>>, vector<96x512xf32>
    %cst_11 = arith.constant dense<0.000000e+00> : vector<8x512xf32>
    %10 = tpu.matmul %3, %9, %cst_11 {dimension_numbers = #tpu.dot_dimension_numbers<[1], [0], [0], [1], [0, 0, 1, 1], [], []>} : vector<8x96xf32>, vector<96x512xf32>, vector<8x512xf32> -> vector<8x512xf32>
    %c0_12 = arith.constant 0 : index
    %c0_13 = arith.constant 0 : index
    %11 = vector.load %arg6[%c0_12, %c0_13] : memref<1x512xf32, #tpu.memory_space<vmem>>, vector<1x512xf32>
    %12 = vector.broadcast %11 : vector<1x512xf32> to vector<8x512xf32>
    %13 = arith.addf %10, %12 : vector<8x512xf32>
    %14 = vector.extract_strided_slice %13 {offsets = [0, 0], sizes = [8, 256], strides = [1, 1]} : vector<8x512xf32> to vector<8x256xf32>
    %15 = vector.extract_strided_slice %13 {offsets = [0, 256], sizes = [8, 256], strides = [1, 1]} : vector<8x512xf32> to vector<8x256xf32>
    %16 = vector.shape_cast %8 : vector<16x256xf32> to vector<16x2x128xf32>
    %17 = tpu.transpose %16, [1, 0, 2] : vector<16x2x128xf32> -> vector<2x16x128xf32>
    %18 = vector.shape_cast %14 : vector<8x256xf32> to vector<8x2x128xf32>
    %19 = tpu.transpose %18, [1, 0, 2] : vector<8x2x128xf32> -> vector<2x8x128xf32>
    %20 = vector.shape_cast %15 : vector<8x256xf32> to vector<8x2x128xf32>
    %21 = tpu.transpose %20, [1, 0, 2] : vector<8x2x128xf32> -> vector<2x8x128xf32>
    "tpu.trace_start"() <{level = 10 : i32, message = "hqd,hkd->hqk"}> : () -> ()
    %cst_14 = arith.constant dense<0.000000e+00> : vector<2x16x8xf32>
    %22 = tpu.matmul %17, %19, %cst_14 {dimension_numbers = #tpu.dot_dimension_numbers<[2], [2], [1], [1], [0, 0, 0, 1, 1, 1], [0], [0]>} : vector<2x16x128xf32>, vector<2x8x128xf32>, vector<2x16x8xf32> -> vector<2x16x8xf32>
    "tpu.trace_stop"() : () -> ()
    %cst_15 = arith.constant dense<0xFF800000> : vector<2x16xf32>
    %23 = vector.multi_reduction <maximumf>, %22, %cst_15 [2] : vector<2x16x8xf32> to vector<2x16xf32>
    %24 = vector.shape_cast %23 : vector<2x16xf32> to vector<2x16x1xf32>
    %25 = vector.broadcast %24 : vector<2x16x1xf32> to vector<2x16x8xf32>
    %26 = arith.subf %22, %25 : vector<2x16x8xf32>
    %27 = math.exp %26 : vector<2x16x8xf32>
    %cst_16 = arith.constant dense<0.000000e+00> : vector<2x16xf32>
    %28 = vector.multi_reduction <add>, %27, %cst_16 [2] : vector<2x16x8xf32> to vector<2x16xf32>
    %29 = vector.shape_cast %28 : vector<2x16xf32> to vector<2x16x1xf32>
    %30 = tpu.reciprocal %29 {approx = true} : vector<2x16x1xf32> -> vector<2x16x1xf32>
    %31 = vector.broadcast %30 : vector<2x16x1xf32> to vector<2x16x8xf32>
    %32 = arith.mulf %27, %31 : vector<2x16x8xf32>
    "tpu.trace_start"() <{level = 10 : i32, message = "hqk,hkd->hqd"}> : () -> ()
    %cst_17 = arith.constant dense<0.000000e+00> : vector<2x16x128xf32>
    %33 = tpu.matmul %32, %21, %cst_17 {dimension_numbers = #tpu.dot_dimension_numbers<[2], [1], [1], [2], [0, 0, 0, 1, 1, 2], [0], [0]>} : vector<2x16x8xf32>, vector<2x8x128xf32>, vector<2x16x128xf32> -> vector<2x16x128xf32>
    "tpu.trace_stop"() : () -> ()
    %34 = tpu.transpose %33, [1, 0, 2] : vector<2x16x128xf32> -> vector<16x2x128xf32>
    %35 = vector.shape_cast %34 : vector<16x2x128xf32> to vector<16x256xf32>
    %c0_18 = arith.constant 0 : index
    %c0_19 = arith.constant 0 : index
    %36 = vector.load %arg7[%c0_18, %c0_19] : memref<256x256xf32, #tpu.memory_space<vmem>>, vector<256x256xf32>
    %cst_20 = arith.constant dense<0.000000e+00> : vector<16x256xf32>
    %37 = tpu.matmul %35, %36, %cst_20 {dimension_numbers = #tpu.dot_dimension_numbers<[1], [0], [0], [1], [0, 0, 1, 1], [], []>} : vector<16x256xf32>, vector<256x256xf32>, vector<16x256xf32> -> vector<16x256xf32>
    %c0_21 = arith.constant 0 : index
    %c0_22 = arith.constant 0 : index
    %38 = vector.load %arg8[%c0_21, %c0_22] : memref<1x256xf32, #tpu.memory_space<vmem>>, vector<1x256xf32>
    %39 = vector.broadcast %38 : vector<1x256xf32> to vector<16x256xf32>
    %40 = arith.addf %37, %39 : vector<16x256xf32>
    %c0_23 = arith.constant 0 : index
    %c0_24 = arith.constant 0 : index
    %c0_25 = arith.constant 0 : index
    %41 = vector.load %arg9[%c0_23, %c0_24, %c0_25] : memref<1x16x256xf32, #tpu.memory_space<vmem>>, vector<1x16x256xf32>
    %42 = vector.shape_cast %41 : vector<1x16x256xf32> to vector<16x256xf32>
    %43 = vector.shape_cast %40 : vector<16x256xf32> to vector<1x16x256xf32>
    tpu.vector_store %arg9[%c0_23, %c0_24, %c0_25], %43 {strides = array<i32>} : memref<1x16x256xf32, #tpu.memory_space<vmem>>, vector<1x16x256xf32>,
    return
  }
  func.func @transform_0(%arg0: i32) -> (i32, i32, i32) {
    %c0_i32 = arith.constant 0 : i32
    %c0_i32_0 = arith.constant 0 : i32
    %c0_i32_1 = arith.constant 0 : i32
    return %arg0, %c0_i32, %c0_i32_0 : i32, i32, i32
  }
  func.func @transform_1(%arg0: i32) -> (i32, i32, i32) {
    %c0_i32 = arith.constant 0 : i32
    %c0_i32_0 = arith.constant 0 : i32
    %c0_i32_1 = arith.constant 0 : i32
    return %arg0, %c0_i32, %c0_i32_0 : i32, i32, i32
  }
  func.func @transform_2(%arg0: i32) -> (i32, i32) {
    %c0_i32 = arith.constant 0 : i32
    %c0_i32_0 = arith.constant 0 : i32
    %c0_i32_1 = arith.constant 0 : i32
    return %c0_i32, %c0_i32_0 : i32, i32
  }
  func.func @transform_3(%arg0: i32) -> (i32, i32) {
    %c0_i32 = arith.constant 0 : i32
    %c0_i32_0 = arith.constant 0 : i32
    %c0_i32_1 = arith.constant 0 : i32
    return %c0_i32, %c0_i32_0 : i32, i32
  }
  func.func @transform_4(%arg0: i32) -> (i32, i32) {
    %c0_i32 = arith.constant 0 : i32
    %c0_i32_0 = arith.constant 0 : i32
    %c0_i32_1 = arith.constant 0 : i32
    return %c0_i32, %c0_i32_0 : i32, i32
  }
  func.func @transform_5(%arg0: i32) -> (i32, i32) {
    %c0_i32 = arith.constant 0 : i32
    %c0_i32_0 = arith.constant 0 : i32
    %c0_i32_1 = arith.constant 0 : i32
    return %c0_i32, %c0_i32_0 : i32, i32
  }
  func.func @transform_6(%arg0: i32) -> (i32, i32) {
    %c0_i32 = arith.constant 0 : i32
    %c0_i32_0 = arith.constant 0 : i32
    %c0_i32_1 = arith.constant 0 : i32
    return %c0_i32, %c0_i32_0 : i32, i32
  }
  func.func @transform_7(%arg0: i32) -> (i32, i32) {
    %c0_i32 = arith.constant 0 : i32
    %c0_i32_0 = arith.constant 0 : i32
    %c0_i32_1 = arith.constant 0 : i32
    return %c0_i32, %c0_i32_0 : i32, i32
  }
  func.func @transform_8(%arg0: i32) -> (i32, i32, i32) {
    %c0_i32 = arith.constant 0 : i32
    %c0_i32_0 = arith.constant 0 : i32
    %c0_i32_1 = arith.constant 0 : i32
    return %arg0, %c0_i32, %c0_i32_0 : i32, i32, i32
  }
}

</mosaic_0001>

<bundles_post_ra>
// kernel: tpu_custom_call.1
= control target key start
LH: loop header
LB: loop body
LE: loop exit
PB: predicated region body
PF: predicated region fallthrough
CT: control target
= control target key end

     0   :  { %s2701_s0 = inlined_call_operand.hbm [shape: f32[2,16,256], index: 0, kind: input, shape index: {}]   ;;  %s2702_s1 = inlined_call_operand.hbm [shape: f32[2,8,96], index: 1, kind: input, shape index: {}]   ;;  %s2703_s2 = inlined_call_operand.hbm [shape: f32[256,256], index: 2, kind: input, shape index: {}]   ;;  %s2704_s3 = inlined_call_operand.hbm [shape: f32[1,256], index: 3, kind: input, shape index: {}]   ;;  %s2705_s4 = inlined_call_operand.hbm [shape: f32[96,512], index: 4, kind: input, shape index: {}]   ;;  %s2706_s5 = inlined_call_operand.vmem [shape: f32[1,512], index: 5, kind: input, shape index: {}]   ;;  %s2707_s6 = inlined_call_operand.hbm [shape: f32[256,256], index: 6, kind: input, shape index: {}]   ;;  %s2708_s7 = inlined_call_operand.vmem [shape: f32[1,256], index: 7, kind: input, shape index: {}]   ;;  %s2709_s8 = inlined_call_operand.hbm [shape: f32[2,16,256], index: 8, kind: output, shape index: {}]  }
   0x1   :  { %2715 = sst [smem:[#allocation23_spill]] %s2703_s2 }
   0x2   :  { %2716 = sst [smem:[#allocation24_spill]] %s2704_s3 }
   0x3   :  { %2717 = sst [smem:[#allocation25_spill]] %s2705_s4 }
   0x4   :  { %2718 = sst [smem:[#allocation26_spill]] %s2707_s6 }
   0x5   :  { %13 = vsyncpa [#allocation3], 0 }
   0x6   :  { %15 = vsyncpa [#allocation3 + $0x1], 0 }
   0x7   :  { %16 = vsyncpa [#allocation6], 0 }
   0x8   :  { %18 = vsyncpa [#allocation6 + $0x1], 0 }
   0x9   :  { %19 = vsyncpa [#allocation9], 0 }
   0xa   :  { %20 = vsyncpa [#allocation12], 0 }
   0xb   :  { %21 = vsyncpa [#allocation4], 0 }
   0xc   :  { %23 = vsyncpa [#allocation4 + $0x1], 0  ;;  %s2216_s27 = smov 0   ;;  %s2218_s28 = smov 0  }
   0xd   :  { %s2220_s29 = smov 0   ;;  %s2222_s30 = smov 0  }
   0xe LB: > { %2719 = sst [smem:[#allocation20_spill]] %s2153_s29  ;;  %s2237_s9 = sadd.s32 4294967295, %s2157_s30   ;;  %s2157_s30 = sphi %s2222_s30, %s2735_s30   ;;  %s2153_s29 = sphi %s2220_s29, %s2737_s29   ;;  %s2149_s28 = sphi %s2218_s28, %s2739_s28   ;;  %s2145_s27 = sphi %s2216_s27, %s2738_s27  }
   0xf   : > { %s1744_s10 = sadd.s32 4294967294, %s2157_s30   ;;  %p49_p0 = scmp.ne.s32.totalorder %s2149_s28, %s2145_s27 }
  0x10   : > { %p50_p1 = scmp.eq.s32.totalorder %s2237_s9, 0  ;;  %p225_p2 = scmp.eq.s32.totalorder %s2237_s9, 1 }
  0x11   : > { %p231_p3 = scmp.eq.s32.totalorder %s1744_s10, 1  ;;  %p1745_p5 = scmp.ge.s32.totalorder %s2157_s30, 1 }
  0x12   : > { %p2246_p4 = por %p50_p1, %p49_p0  ;;  %p238_p7 = scmp.lt.s32.totalorder %s2157_s30, 3 }
  0x13   : > { %p2251_p6 = por %p231_p3, %p49_p0  ;;  %s2722_s2 = sld [smem:[#allocation23_spill]] }
  0x14   : > { %p2259_p8 = pnand %p1745_p5, %p238_p7  ;;  %s2159_s17 = smov [#allocation7]  }
  0x15   : > { %s251_s18 = sshll.u32 %s2159_s17, 4  ;;  %s2725_s3 = sld [smem:[#allocation24_spill]]  ;;  %s252_s18 = int_to_ptr.vmem [resolvable:$true] %s251_s18 }
  0x16   : > { %p1801_p9 = pneg %p2259_p8  ;;  %s2710_s23 = smov 256  }
  0x17   : > { %s2711_s24 = smov 16   ;;  %s2162_s25 = smov [#allocation8]  }
  0x18   : > { %p2267_p10 = pnand %p1801_p9, %p50_p1  ;;  %s266_s26 = sshll.u32 %s2162_s25, 4  ;;  %s267_s26 = int_to_ptr.vmem [resolvable:$true] %s266_s26 }
  0x19   : > { %s249_s15 = sshll.u32 %s2722_s2, 4  ;;  %s2726_s4 = sld [smem:[#allocation25_spill]]  ;;  %s250_s15 = int_to_ptr.hbm [resolvable:$true] %s249_s15 }
  0x1a   : > { %1804 = dma.hbm_to_vmem [thread:$0]  (!%p2267_p10), %s250_s15, 8192, %s252_s18, [#allocation6], %s2710_s23, %s2710_s23, %s2711_s24  }
  0x1b   : > { %s264_s22 = sshll.u32 %s2725_s3, 4  ;;  %s2163_s17 = smov [#allocation10]   ;;  %s265_s22 = int_to_ptr.hbm [resolvable:$true] %s264_s22 }
  0x1c   : > { %1807 = dma.hbm_to_vmem [thread:$0]  (!%p2267_p10), %s265_s22, 32, %s267_s26, [#allocation9]  }
  0x1d   : > { %s277_s20 = sshll.u32 %s2163_s17, 4  ;;  %s2727_s6 = sld [smem:[#allocation26_spill]]  ;;  %s278_s20 = int_to_ptr.vmem [resolvable:$true] %s277_s20 }
  0x1e   : > { %s2164_s25 = smov 512   ;;  %s2165_s10 = smov 32  }
  0x1f   : > { %s275_s14 = sshll.u32 %s2726_s4, 4  ;;  %s2166_s22 = smov [#allocation11]   ;;  %s276_s14 = int_to_ptr.hbm [resolvable:$true] %s275_s14 }
  0x20   : > { %1810 = dma.hbm_to_vmem [thread:$0]  (!%p2267_p10), %s276_s14, 6144, %s278_s20, [#allocation9], %s2164_s25, %s2164_s25, %s2165_s10  }
  0x21   : > { %s294_s26 = sshll.u32 %s2166_s22, 4  ;;  %s2296_s13 = sadd.s32 1, %s2157_s30   ;;  %s295_s26 = int_to_ptr.vmem [resolvable:$true] %s294_s26 }
  0x22   : > { %2728 = sst [smem:[#allocation21_spill]] %s2296_s13  ;;  %s36_s17 = sadd.s32 1, %s2153_s29 }
  0x23   : > { %s292_s21 = sshll.u32 %s2727_s6, 4  ;;  %s33_s15 = ssub.s32 %s2157_s30, %s2296_s13  ;;  %s293_s21 = int_to_ptr.hbm [resolvable:$true] %s292_s21 }
  0x24   : > { %1813 = dma.hbm_to_vmem [thread:$0]  (!%p2267_p10), %s293_s21, 8192, %s295_s26, [#allocation12], %s2710_s23, %s2710_s23, %s2711_s24  }
  0x25   : > { %p43_p12 = scmp.ne.s32.totalorder %s2153_s29, %s2149_s28  ;;  %p34_p13 = scmp.eq.s32.totalorder %s33_s15, 0 }
  0x26   : > { %p44_p0 = scmp.eq.s32.totalorder %s2157_s30, 0  ;;  %p1829_p5 = scmp.lt.s32.totalorder %s2157_s30, 2 }
  0x27   : > { %p2306_p3 = por %p225_p2, %p43_p12  ;;  %s2315_s20 = sand.u32 1, %s2153_s29  }
  0x28   : > { %s2312_s19 = scalar_select %p34_p13, %s2153_s29, %s36_s17  }
  0x29   : > { %p45_p7 = por %p44_p0, %p43_p12  ;;  %s1751_s18 = sshll.u32 %s2315_s20, 5 }
  0x2a   : > { %2730 = sst [smem:[#allocation22_spill]] %s2312_s19  ;;  %s1777_s21 = sshll.u32 %s2157_s30, 5 }
  0x2b   : > { %s320_s22 = scalar_lea.hbm %s2701_s0, %s1777_s21  ;;  %s315_s26 = scalar_lea.vmem [#allocation2], %s1751_s18 }
  0x2c   : > { %s323_s15 = sshll.u32 %s315_s26, 4  ;;  %s321_s23 = sshll.u32 %s320_s22, 4  ;;  %s324_s15 = int_to_ptr.vmem [resolvable:$true] %s323_s15  ;;  %s322_s23 = int_to_ptr.hbm [resolvable:$true] %s321_s23 }
  0x2d   : > { %p2322_p2 = pnand %p1829_p5, %p45_p7  ;;  %s333_s24 = sand.u32 1, %s2157_s30  }
  0x2e   : > { %s1754_s2 = sshll.u32 %s2315_s20, 3  ;;  %s312_s3 = scalar_lea.sflag [#allocation3], %s2315_s20 }
  0x2f   : > { %s2015_s4 = sshra.s32 %s322_s23, 4  ;;  %p2019_p10 = pneg %p2322_p2  ;;  %s2016_s4 = int_to_ptr.hbm [resolvable:$true] %s2015_s4 }
  0x30   : > { %s2017_s6 = scalar_lea.hbm %s2016_s4, 32  ;;  %s2022_s25 = scalar_lea.hbm %s2701_s0, 64 }
  0x31   : > { %p2018_p9 = scmp.ne.s32.totalorder %s2016_s4, %s2017_s6  ;;  %p2023_p0 = scmp.lt.s32.totalorder %s2016_s4, %s2701_s0 }
  0x32   : > { %p2024_p5 = scmp.lt.s32.totalorder %s2022_s25, %s2017_s6 }
  0x33   : > { %p2020_p12 = pnand %p2019_p10, %p2018_p9 }
  0x34   : > { %p2025_p7 = por %p2024_p5, %p2023_p0 }
  0x35   : > { %p2021_p13 = pneg %p2020_p12 }
  0x37   : > { %p2026_p11 = pnand %p2025_p7, %p2021_p13 }
  0x39   : > { %2029 = shalt.err (!%p2026_p11)
}
  0x3a   : > { %s2732_s20 = smov 16   ;;  %s2733_s26 = smov 256  }
  0x3b   : > { %1817 = dma.hbm_to_vmem [thread:$0]  (!%p2322_p2), %s322_s23, 512, %s324_s15, %s312_s3, %s2733_s26, %s2733_s26, %s2732_s20  }
  0x3c   : > { %s1755_s19 = sshll.u32 %s2157_s30, 3  ;;  %s337_s13 = scalar_lea.vmem [#allocation5], %s1754_s2 }
  0x3d   : > { %s341_s21 = scalar_lea.hbm %s2702_s1, %s1755_s19  ;;  %s345_s10 = sshll.u32 %s337_s13, 4  ;;  %s346_s10 = int_to_ptr.vmem [resolvable:$true] %s345_s10 }
  0x3e   : > { %s343_s4 = sshll.u32 %s341_s21, 4  ;;  %s334_s6 = scalar_lea.sflag [#allocation6], %s333_s24  ;;  %s344_s4 = int_to_ptr.hbm [resolvable:$true] %s343_s4 }
  0x3f   : > { %s2045_s25 = sshra.s32 %s344_s4, 4  ;;  %s2052_s15 = scalar_lea.hbm %s2702_s1, 16  ;;  %s2046_s25 = int_to_ptr.hbm [resolvable:$true] %s2045_s25 }
  0x40   : > { %s2047_s22 = scalar_lea.hbm %s2046_s25, 8  ;;  %p2053_p13 = scmp.lt.s32.totalorder %s2046_s25, %s2702_s1 }
  0x41   : > { %p2048_p11 = scmp.ne.s32.totalorder %s2046_s25, %s2047_s22  ;;  %p2054_p0 = scmp.lt.s32.totalorder %s2052_s15, %s2047_s22 }
  0x43   : > { %p2050_p9 = pnand %p2048_p11, %p2019_p10  ;;  %p2055_p5 = por %p2054_p0, %p2053_p13 }
  0x45   : > { %p2051_p12 = pneg %p2050_p9 }
  0x47   : > { %p2056_p7 = pnand %p2055_p5, %p2051_p12 }
  0x49   : > { %2059 = shalt.err (!%p2056_p7)
}
  0x4a   : > { %1820 = dma.hbm_to_vmem [thread:$0]  (!%p2322_p2), %s344_s4, 128, %s346_s10, %s334_s6  }
  0x4b   : > { %354 = sbr.rel (%p2259_p8) target bundleno = 996 (0x3e4), region = 52  ;;  %s2363_s2 = sand.u32 (!%p2259_p8), 1, %s2149_s28  }
  0x4c   : > { %s1757_s24 = sshll.u32 (!%p2259_p8), %s2363_s2, 5  ;;  %s357_s13 = scalar_lea.sflag (!%p2259_p8), [#allocation3], %s2363_s2 }
  0x4d   : > { %s2369_s20 = scalar_lea.vmem (!%p2259_p8), [#allocation2], %s1757_s24 }
  0x50   : > { %2120 = dma.done.wait (%p2246_p4), %s357_s13, 512  }
  0x51   : > { %2122 = vsyncadd (%p2246_p4), %s357_s13, 4294966784  ;;  %s366_s16 = sand.u32 1, %s2237_s9   ;;  %s1758_s17 = sshll.u32 %s2363_s2, 3 }
  0x52   : > { %s367_s26 = scalar_lea.sflag [#allocation6], %s366_s16  ;;  %s2377_s18 = scalar_lea.vmem [#allocation5], %s1758_s17 }
  0x53   : > { %2124 = dma.done.wait (%p2246_p4), %s367_s26, 128  }
  0x54   : > { %2126 = vsyncadd (%p2246_p4), %s367_s26, 4294967168 }
  0x55   : > { %2128 = dma.done.wait (%p50_p1), [#allocation6], 8192  }
  0x56   : > { %2130 = vsyncadd (%p50_p1), [#allocation6], 4294959104 }
  0x57   : > { %2132 = dma.done.wait (%p50_p1), [#allocation9], 6176  }
  0x58   : > { %2134 = vsyncadd (%p50_p1), [#allocation9], 4294961120 }
  0x59   : > { %2136 = dma.done.wait (%p50_p1), [#allocation12], 8192  }
  0x5a   : > { %2138 = vsyncadd (%p50_p1), [#allocation12], 4294959104  ;;  %v464_v0 = vld [vmem:[#allocation7 + $0xf0] sm:$0xff]  ;;  %v465_v2 = vld [vmem:[#allocation7 + $0xf8] sm:$0xff]  ;;  %vm654_vm0 = vcmask 785408   ;;  %vm739_vm1 = vcmask 1047556  }
  0x5b   : > { %v496_v1 = vld [vmem:[#allocation7 + $0x1f0] sm:$0xff]  ;;  %504 = vmatpush.msra.mxu0 %v464_v0  ;;  %v462_v3 = vld [vmem:[#allocation7 + $0xe0] sm:$0xff]  ;;  %v463_v5 = vld [vmem:[#allocation7 + $0xe8] sm:$0xff]  ;;  %550 = vmatpush.msra.mxu2 %v465_v2  ;;  %vm1145_vm2 = vcmask 64512   ;;  %s428_s6 = scalar_lea.vmem [#allocation13], %s1757_s24  ;;  %s1778_s25 = sshll.u32 %s2237_s9, 5 }
  0x5c   : > { %527 = vmatpush.msra.mxu1 %v496_v1  ;;  %v494_v4 = vld [vmem:[#allocation7 + $0x1e0] sm:$0xff]  ;;  %v497_v6 = vld [vmem:[#allocation7 + $0x1f8] sm:$0xff]  ;;  %v460_v7 = vld [vmem:[#allocation7 + $0xd0] sm:$0xff]  ;;  %s1606_s23 = scalar_lea.hbm %s2709_s8, %s1778_s25  ;;  %s1607_s15 = sshll.u32 %s428_s6, 4  ;;  %s1608_s15 = int_to_ptr.vmem [resolvable:$true] %s1607_s15 }
  0x5d   : > { %v492_v8 = vld [vmem:[#allocation7 + $0x1d0] sm:$0xff]  ;;  %505 = vmatpush.msra.mxu0 %v462_v3  ;;  %v461_v9 = vld [vmem:[#allocation7 + $0xd8] sm:$0xff]  ;;  %v495_v10 = vld [vmem:[#allocation7 + $0x1e8] sm:$0xff]  ;;  %551 = vmatpush.msra.mxu2 %v463_v5  ;;  %s1609_s29 = sshll.u32 %s1606_s23, 4  ;;  %s1595_s9 = scalar_lea.sflag [#allocation4], %s2363_s2  ;;  %s1610_s29 = int_to_ptr.hbm [resolvable:$true] %s1609_s29 }
  0x5e   : > { %528 = vmatpush.msra.mxu1 %v494_v4  ;;  %573 = vmatpush.msra.mxu3 %v497_v6  ;;  %v458_v11 = vld [vmem:[#allocation7 + $0xc0] sm:$0xff]  ;;  %v459_v13 = vld [vmem:[#allocation7 + $0xc8] sm:$0xff]  ;;  %v493_v14 = vld [vmem:[#allocation7 + $0x1d8] sm:$0xff]  ;;  %s2089_s19 = sshra.s32 %s1610_s29, 4  ;;  %s2095_s16 = scalar_lea.hbm %s2709_s8, 64  ;;  %s2090_s19 = int_to_ptr.hbm [resolvable:$true] %s2089_s19 }
  0x5f   : > { %v490_v12 = vld [vmem:[#allocation7 + $0x1c0] sm:$0xff]  ;;  %506 = vmatpush.msra.mxu0 %v460_v7  ;;  %552 = vmatpush.msra.mxu2 %v461_v9  ;;  %v456_v15 = vld [vmem:[#allocation7 + $0xb0] sm:$0xff]  ;;  %v457_v17 = vld [vmem:[#allocation7 + $0xb8] sm:$0xff]  ;;  %s2091_s24 = scalar_lea.hbm %s2090_s19, 32  ;;  %p2096_p2 = scmp.lt.s32.totalorder %s2090_s19, %s2709_s8 }
  0x60   : > { %529 = vmatpush.msra.mxu1 %v492_v8  ;;  %574 = vmatpush.msra.mxu3 %v495_v10  ;;  %v488_v16 = vld [vmem:[#allocation7 + $0x1b0] sm:$0xff]  ;;  %v491_v18 = vld [vmem:[#allocation7 + $0x1c8] sm:$0xff]  ;;  %v454_v19 = vld [vmem:[#allocation7 + $0xa0] sm:$0xff]  ;;  %p2092_p1 = scmp.ne.s32.totalorder %s2090_s19, %s2091_s24  ;;  %p2097_p10 = scmp.lt.s32.totalorder %s2095_s16, %s2091_s24 }
  0x61   : > { %507 = vmatpush.msra.mxu0 %v458_v11  ;;  %553 = vmatpush.msra.mxu2 %v459_v13  ;;  %v486_v20 = vld [vmem:[#allocation7 + $0x1a0] sm:$0xff]  ;;  %v455_v21 = vld [vmem:[#allocation7 + $0xa8] sm:$0xff]  ;;  %v489_v22 = vld [vmem:[#allocation7 + $0x1b8] sm:$0xff] }
  0x62   : > { %530 = vmatpush.msra.mxu1 %v490_v12  ;;  %575 = vmatpush.msra.mxu3 %v493_v14  ;;  %v452_v23 = vld [vmem:[#allocation7 + $0x90] sm:$0xff]  ;;  %v453_v25 = vld [vmem:[#allocation7 + $0x98] sm:$0xff]  ;;  %v487_v26 = vld [vmem:[#allocation7 + $0x1a8] sm:$0xff]  ;;  %p2093_p4 = pnand %p2092_p1, %p2306_p3  ;;  %p2098_p11 = por %p2097_p10, %p2096_p2 }
  0x63   : > { %508 = vmatpush.msra.mxu0 %v456_v15  ;;  %554 = vmatpush.msra.mxu2 %v457_v17  ;;  %v484_v24 = vld [vmem:[#allocation7 + $0x190] sm:$0xff]  ;;  %v450_v27 = vld [vmem:[#allocation7 + $0x80] sm:$0xff]  ;;  %v451_v29 = vld [vmem:[#allocation7 + $0x88] sm:$0xff] }
  0x64   : > { %531 = vmatpush.msra.mxu1 %v488_v16  ;;  %576 = vmatpush.msra.mxu3 %v491_v18  ;;  %v482_v28 = vld [vmem:[#allocation7 + $0x180] sm:$0xff]  ;;  %v485_v30 = vld [vmem:[#allocation7 + $0x198] sm:$0xff]  ;;  %v448_v31 = vld [vmem:[#allocation7 + $0x70] sm:$0xff]  ;;  %p2094_p8 = pneg %p2093_p4 }
  0x65   : > { %509 = vmatpush.msra.mxu0 %v454_v19  ;;  %555 = vmatpush.msra.mxu2 %v455_v21  ;;  %v480_v32 = vld [vmem:[#allocation7 + $0x170] sm:$0xff]  ;;  %v449_v33 = vld [vmem:[#allocation7 + $0x78] sm:$0xff]  ;;  %v483_v34 = vld [vmem:[#allocation7 + $0x188] sm:$0xff] }
  0x66   : > { %532 = vmatpush.msra.mxu1 %v486_v20  ;;  %577 = vmatpush.msra.mxu3 %v489_v22  ;;  %v446_v35 = vld [vmem:[#allocation7 + $0x60] sm:$0xff]  ;;  %v447_v37 = vld [vmem:[#allocation7 + $0x68] sm:$0xff]  ;;  %v481_v38 = vld [vmem:[#allocation7 + $0x178] sm:$0xff]  ;;  %p2099_p9 = pnand %p2098_p11, %p2094_p8 }
  0x67   : > { %510 = vmatpush.msra.mxu0 %v452_v23  ;;  %556 = vmatpush.msra.mxu2 %v453_v25  ;;  %v478_v36 = vld [vmem:[#allocation7 + $0x160] sm:$0xff]  ;;  %v444_v39 = vld [vmem:[#allocation7 + $0x50] sm:$0xff]  ;;  %v445_v41 = vld [vmem:[#allocation7 + $0x58] sm:$0xff] }
  0x68   : > { %533 = vmatpush.msra.mxu1 %v484_v24  ;;  %578 = vmatpush.msra.mxu3 %v487_v26  ;;  %v476_v40 = vld [vmem:[#allocation7 + $0x150] sm:$0xff]  ;;  %v479_v42 = vld [vmem:[#allocation7 + $0x168] sm:$0xff]  ;;  %v442_v43 = vld [vmem:[#allocation7 + $0x40] sm:$0xff] }
  0x69   : > { %511 = vmatpush.msra.mxu0 %v450_v27  ;;  %557 = vmatpush.msra.mxu2 %v451_v29  ;;  %v474_v44 = vld [vmem:[#allocation7 + $0x140] sm:$0xff]  ;;  %v443_v45 = vld [vmem:[#allocation7 + $0x48] sm:$0xff]  ;;  %v477_v46 = vld [vmem:[#allocation7 + $0x158] sm:$0xff] }
  0x6a   : > { %534 = vmatpush.msra.mxu1 %v482_v28  ;;  %579 = vmatpush.msra.mxu3 %v485_v30  ;;  %v440_v47 = vld [vmem:[#allocation7 + $0x30] sm:$0xff]  ;;  %v441_v49 = vld [vmem:[#allocation7 + $0x38] sm:$0xff]  ;;  %v475_v50 = vld [vmem:[#allocation7 + $0x148] sm:$0xff] }
  0x6b   : > { %512 = vmatpush.msra.mxu0 %v448_v31  ;;  %558 = vmatpush.msra.mxu2 %v449_v33  ;;  %v472_v48 = vld [vmem:[#allocation7 + $0x130] sm:$0xff]  ;;  %v438_v51 = vld [vmem:[#allocation7 + $0x20] sm:$0xff]  ;;  %v439_v53 = vld [vmem:[#allocation7 + $0x28] sm:$0xff]  ;;  %v2167_v31 = vmov 1983009808  }
  0x6c   : > { %535 = vmatpush.msra.mxu1 %v480_v32  ;;  %580 = vmatpush.msra.mxu3 %v483_v34  ;;  %v470_v52 = vld [vmem:[#allocation7 + $0x120] sm:$0xff]  ;;  %v473_v54 = vld [vmem:[#allocation7 + $0x138] sm:$0xff]  ;;  %v436_v55 = vld [vmem:[#allocation7 + $0x10] sm:$0xff]  ;;  %v742_v32 = vunpack.c.l.s4 %v2167_v31 }
  0x6d   : > { %513 = vmatpush.msra.mxu0 %v446_v35  ;;  %559 = vmatpush.msra.mxu2 %v447_v37  ;;  %v468_v56 = vld [vmem:[#allocation7 + $0x110] sm:$0xff]  ;;  %v437_v57 = vld [vmem:[#allocation7 + $0x18] sm:$0xff]  ;;  %v471_v58 = vld [vmem:[#allocation7 + $0x128] sm:$0xff] }
  0x6e   : > { %536 = vmatpush.msra.mxu1 %v478_v36  ;;  %581 = vmatpush.msra.mxu3 %v481_v38  ;;  %v434_v59 = vld [vmem:[#allocation7] sm:$0xff]  ;;  %v435_v61 = vld [vmem:[#allocation7 + $0x8] sm:$0xff]  ;;  %v469_v62 = vld [vmem:[#allocation7 + $0x118] sm:$0xff]  ;;  %v2406_v37 = vunpack.c.0.s8 %v742_v32 }
  0x6f   : > { %514 = vmatpush.msra.mxu0 %v444_v39  ;;  %560 = vmatpush.msra.mxu2 %v445_v41  ;;  %v466_v60 = vld [vmem:[#allocation7 + $0x100] sm:$0xff]  ;;  %v429_v63 = vld [vmem:[%s2369_s20] sm:$0xff]  ;;  %v467_v2 = vld [vmem:[#allocation7 + $0x108] sm:$0xff] }
  0x70   : > { %537 = vmatpush.msra.mxu1 %v476_v40  ;;  %582 = vmatpush.msra.mxu3 %v479_v42  ;;  %v640_v0 = vld [vmem:[#allocation10 + $0x160] sm:$0xff]  ;;  %v641_v1 = vld [vmem:[#allocation10 + $0x168] sm:$0xff]  ;;  %v430_v3 = vld [vmem:[%s2369_s20 + $0x8] sm:$0xff]  ;;  %v2168_v40 = vmov 1934713408  }
  0x71   : > { %515 = vmatpush.msra.mxu0 %v442_v43  ;;  %561 = vmatpush.msra.mxu2 %v443_v45  ;;  %v636_v4 = vld [vmem:[#allocation10 + $0x140] sm:$0xff]  ;;  %v637_v5 = vld [vmem:[#allocation10 + $0x148] sm:$0xff]  ;;  %v498_v29 = vld [vmem:[#allocation8] sm:$0x3]  ;;  %v764_v41 = vunpack.c.l.s4 %v2168_v40 }
  0x72   : > { %538 = vmatpush.msra.mxu1 %v474_v44  ;;  %583 = vmatpush.msra.mxu3 %v477_v46  ;;  %v632_v6 = vld [vmem:[#allocation10 + $0x120] sm:$0xff]  ;;  %v633_v7 = vld [vmem:[#allocation10 + $0x128] sm:$0xff]  ;;  %v500_v30 = vperm.slane %v498_v29, 0  ;;  %v501_v34 = vperm.slane %v498_v29, 1 }
  0x73   : > { %516 = vmatpush.msra.mxu0 %v440_v47  ;;  %562 = vmatpush.msra.mxu2 %v441_v49  ;;  %v628_v8 = vld [vmem:[#allocation10 + $0x100] sm:$0xff]  ;;  %v629_v9 = vld [vmem:[#allocation10 + $0x108] sm:$0xff]  ;;  %v2410_v49 = vunpack.c.0.s8 %v764_v41 }
  0x74   : > { %539 = vmatpush.msra.mxu1 %v472_v48  ;;  %584 = vmatpush.msra.mxu3 %v475_v50  ;;  %v431_v10 = vld [vmem:[%s2369_s20 + $0x10] sm:$0xff]  ;;  %v625_v12 = vld [vmem:[#allocation10 + $0xe8] sm:$0xff] }
  0x75   : > { %517 = vmatpush.msra.mxu0 %v438_v51  ;;  %563 = vmatpush.msra.mxu2 %v439_v53  ;;  %v624_v11 = vld [vmem:[#allocation10 + $0xe0] sm:$0xff]  ;;  %v621_v15 = vld [vmem:[#allocation10 + $0xc8] sm:$0xff] }
  0x76   : > { %540 = vmatpush.msra.mxu1 %v470_v52  ;;  %585 = vmatpush.msra.mxu3 %v473_v54  ;;  %v432_v13 = vld [vmem:[%s2369_s20 + $0x18] sm:$0xff]  ;;  %v2400_v28 = vld [vmem:[%s2377_s18] sm:$0xff] }
  0x77   : > { %518 = vmatpush.msra.mxu0 %v436_v55  ;;  %564 = vmatpush.msra.mxu2 %v437_v57  ;;  %v620_v14 = vld [vmem:[#allocation10 + $0xc0] sm:$0xff]  ;;  %v617_v17 = vld [vmem:[#allocation10 + $0xa8] sm:$0xff] }
  0x78   : > { %541 = vmatpush.msra.mxu1 %v468_v56  ;;  %586 = vmatpush.msra.mxu3 %v471_v58  ;;  %v616_v16 = vld [vmem:[#allocation10 + $0xa0] sm:$0xff]  ;;  %v613_v19 = vld [vmem:[#allocation10 + $0x88] sm:$0xff] }
  0x79   : > { %519 = vmatpush.msra.mxu0 %v434_v59  ;;  %565 = vmatpush.msra.mxu2 %v435_v61  ;;  %v612_v18 = vld [vmem:[#allocation10 + $0x80] sm:$0xff]  ;;  %v609_v21 = vld [vmem:[#allocation10 + $0x68] sm:$0xff] }
  0x7a   : > { %542 = vmatpush.msra.mxu1 %v466_v60  ;;  %587 = vmatpush.msra.mxu3 %v469_v62  ;;  %v608_v20 = vld [vmem:[#allocation10 + $0x60] sm:$0xff]  ;;  %v605_v23 = vld [vmem:[#allocation10 + $0x48] sm:$0xff] }
  0x7b   : > { %566 = vmatmul.f32.vlgmr.msra.gmra.mxu2 %v429_v63  ;;  %662 = vmatpush.msrb.mxu0 %v640_v0  ;;  %v604_v22 = vld [vmem:[#allocation10 + $0x40] sm:$0xff]  ;;  %v601_v25 = vld [vmem:[#allocation10 + $0x28] sm:$0xff] }
  0x7c   : > { %682 = vmatpush.msrb.mxu1 %v641_v1  ;;  %588 = vmatpush.msra.mxu3 %v467_v2  ;;  %v600_v24 = vld [vmem:[#allocation10 + $0x20] sm:$0xff]  ;;  %v597_v27 = vld [vmem:[#allocation10 + $0x8] sm:$0xff] }
  0x7d   : > { %589 = vmatmul.f32.vlgmr.msra.gmra.mxu3 %v430_v3  ;;  %663 = vmatpush.msrb.mxu0 %v636_v4  ;;  %v596_v26 = vld [vmem:[#allocation10] sm:$0xff] }
  0x7e   : > { %683 = vmatpush.msrb.mxu1 %v637_v5  ;;  %520 = vmatmul.f32.vlgmr.msra.gmra.mxu0 %v429_v63 }
  0x7f   : > { %664 = vmatpush.msrb.mxu0 %v632_v6  ;;  %543 = vmatmul.f32.vlgmr.msra.gmra.mxu1 %v430_v3 }
  0x80   : > { %684 = vmatpush.msrb.mxu1 %v633_v7  ;;  %v2424_v7 = vld [vmem:[%s2706_s5] sm:$0xf] }
  0x81   : > { %665 = vmatpush.msrb.mxu0 %v628_v8 }
  0x82   : > { %685 = vmatpush.msrb.mxu1 %v629_v9 }
  0x83   : > { %569 = vmatmul.f32.gmra.mxu2 %v431_v10  ;;  %666 = vmatpush.msrb.mxu0 %v624_v11 }
  0x84   : > { %686 = vmatpush.msrb.mxu1 %v625_v12 }
  0x85   : > { %592 = vmatmul.f32.gmra.mxu3 %v432_v13  ;;  %667 = vmatpush.msrb.mxu0 %v620_v14 }
  0x86   : > { %687 = vmatpush.msrb.mxu1 %v621_v15  ;;  %523 = vmatmul.f32.gmra.mxu0 %v431_v10 }
  0x87   : > { %668 = vmatpush.msrb.mxu0 %v616_v16  ;;  %546 = vmatmul.f32.gmra.mxu1 %v432_v13  ;;  %v646_v16 = vperm.slane %v2424_v7, 0 }
  0x88   : > { %688 = vmatpush.msrb.mxu1 %v617_v17 }
  0x89   : > { %669 = vmatpush.msrb.mxu0 %v612_v18 }
  0x8a   : > { %689 = vmatpush.msrb.mxu1 %v613_v19 }
  0x8b   : > { %670 = vmatpush.msrb.mxu0 %v608_v20 }
  0x8c   : > { %690 = vmatpush.msrb.mxu1 %v609_v21 }
  0x8d   : > { %671 = vmatpush.msrb.mxu0 %v604_v22  ;;  %v647_v22 = vperm.slane %v2424_v7, 1 }
  0x8e   : > { %691 = vmatpush.msrb.mxu1 %v605_v23 }
  0x8f   : > { %672 = vmatpush.msrb.mxu0 %v600_v24 }
  0x90   : > { %692 = vmatpush.msrb.mxu1 %v601_v25 }
  0x91   : > { %673 = vmatpush.msrb.mxu0 %v596_v26 }
  0x92   : > { %693 = vmatpush.msrb.mxu1 %v597_v27  ;;  %1764 = vmatmul.msk.f32.vlgmr.msrb.gmra.mxu0 %vm654_vm0, %v2400_v28 }
  0x93   : > { %1765 = vmatmul.msk.f32.vlgmr.msrb.gmra.mxu1 %vm654_vm0, %v2400_v28 }
  0xfb   : > { %v521_v33 = vpop.f32.mrf.mxu0 }
  0xfc   : > { %v522_v35 = vadd.f32 %v521_v33, %v500_v30  ;;  %v544_v36 = vpop.f32.mrf.mxu1 }
  0xfe   : > { %v545_v38 = vadd.f32 %v544_v36, %v522_v35  ;;  %v567_v39 = vpop.f32.mrf.mxu2 }
  0xff   : > { %v568_v42 = vadd.f32 %v567_v39, %v501_v34 }
 0x100   : > { %v738_v43 = vrot.slane %v545_v38, 4  ;;  %v744_v44 = vperm.slane %v545_v38, %v2406_v37  ;;  %v590_v45 = vpop.f32.mrf.mxu3 }
 0x101   : > { %v591_v46 = vadd.f32 %v590_v45, %v568_v42 }
 0x102   : > { %v740_v47 = vsel %vm739_vm1, 0.0, %v738_v43  ;;  %v761_v48 = vrot.slane %v744_v44, 4 }
 0x103   : > { %v748_v50 = vperm.slane %v740_v47, %v2406_v37  ;;  %v749_v51 = vrot.slane %v591_v46, 4  ;;  %v754_v52 = vperm.slane %v591_v46, %v2406_v37  ;;  %v524_v53 = vpop.f32.mrf.mxu0 }
 0x104   : > { %v525_v54 = vadd.f32 %v524_v53, %v500_v30  ;;  %v547_v55 = vpop.f32.mrf.mxu1 }
 0x105   : > { %v773_v56 = vrot.slane %v748_v50, 4  ;;  %v750_v57 = vsel %vm739_vm1, 0.0, %v749_v51  ;;  %v759_v58 = vrot.slane %v754_v52, 4  ;;  %v762_v59 = vsel %vm739_vm1, %v754_v52, %v761_v48 }
 0x106   : > { %v758_v60 = vperm.slane %v750_v57, %v2406_v37  ;;  %v770_v61 = vperm.slane %v762_v59, %v2410_v49  ;;  %v548_v62 = vadd.f32 %v547_v55, %v525_v54  ;;  %v570_v63 = vpop.f32.mrf.mxu2 }
 0x107   : > { %v760_v0 = vsel %vm739_vm1, %v759_v58, %v744_v44  ;;  %v571_v1 = vadd.f32 %v570_v63, %v501_v34 }
 0x108   : > { %v766_v2 = vperm.slane %v760_v0, %v2410_v49  ;;  %v771_v3 = vrot.slane %v758_v60, 4  ;;  %v774_v4 = vsel %vm739_vm1, %v758_v60, %v773_v56  ;;  %v785_v5 = vrot.slane %v770_v61, 4  ;;  %v593_v6 = vpop.f32.mrf.mxu3 }
 0x109   : > { %v782_v8 = vperm.slane %v774_v4, %v2410_v49  ;;  %v791_v9 = vrot.slane %v548_v62, 4  ;;  %v796_v10 = vperm.slane %v548_v62, %v2406_v37  ;;  %v594_v11 = vadd.f32 %v593_v6, %v571_v1 }
 0x10a   : > { %v772_v12 = vsel %vm739_vm1, %v771_v3, %v748_v50  ;;  %v783_v14 = vrot.slane %v766_v2, 4  ;;  %v786_v15 = vsel %vm739_vm1, 0.0, %v785_v5  ;;  %v843_v45 = vsel %vm739_vm1, %v785_v5, %v766_v2 }
 0x10b   : > { %v2430_v13 = vperm.slane %v772_v12, %v2410_v49  ;;  %v2434_v17 = vrot.slane %v782_v8, 4  ;;  %v792_v18 = vsel %vm739_vm1, 0.0, %v791_v9  ;;  %v813_v19 = vrot.slane %v796_v10, 4 }
 0x10c   : > { %v801_v20 = vrot.slane %v594_v11, 4  ;;  %v800_v21 = vperm.slane %v792_v18, %v2406_v37  ;;  %v848_v23 = vrot.slane %v786_v15, 4  ;;  %v806_v25 = vperm.slane %v594_v11, %v2406_v37 }
 0x10d   : > { %v784_v26 = vsel %vm739_vm1, 0.0, %v783_v14  ;;  %v787_v27 = vrot.slane %v2430_v13, 4  ;;  %v790_v32 = vsel %vm739_vm1, 0.0, %v2434_v17  ;;  %v847_v63 = vperm.slane %v843_v45, %v2406_v37 }
 0x10e   : > { %v802_v24 = vsel %vm739_vm1, 0.0, %v801_v20  ;;  %v825_v29 = vrot.slane %v800_v21, 4  ;;  %v811_v33 = vrot.slane %v806_v25, 4  ;;  %v814_v34 = vsel %vm739_vm1, %v806_v25, %v813_v19 }
 0x10f   : > { %v810_v30 = vperm.slane %v802_v24, %v2406_v37  ;;  %v675_v31 = vpop.f32.mrf.mxu0  ;;  %v822_v38 = vperm.slane %v814_v34, %v2410_v49  ;;  %v788_v50 = vsel %vm739_vm1, 0.0, %v787_v27  ;;  %v849_v51 = vsel %vm739_vm1, %v848_v23, %v784_v26 }
 0x110   : > { %v676_v35 = vadd.f32 %v675_v31, %v646_v16  ;;  %v695_v36 = vpop.f32.mrf.mxu1  ;;  %v812_v42 = vsel %vm739_vm1, %v811_v33, %v796_v10  ;;  %v859_v52 = vrot.slane %v790_v32, 4  ;;  %v853_v1 = vperm.slane %v849_v51, %v2406_v37 }
 0x111   : > { %v823_v39 = vrot.slane %v810_v30, 4  ;;  %v826_v40 = vsel %vm739_vm1, %v810_v30, %v825_v29  ;;  %v696_v41 = vadd.f32 %v695_v36, %v647_v22  ;;  %v2458_v54 = vperm.slane %v812_v42, %v2410_v49 }
 0x112   : > { %v919_v43 = vrot.slane %v676_v35, 4  ;;  %v924_v44 = vperm.slane %v676_v35, %v2406_v37  ;;  %v834_v47 = vperm.slane %v826_v40, %v2410_v49  ;;  %v837_v55 = vrot.slane %v822_v38, 4 }
 0x113   : > { %v824_v46 = vsel %vm739_vm1, %v823_v39, %v800_v21  ;;  %v929_v48 = vrot.slane %v696_v41, 4  ;;  %v934_v62 = vperm.slane %v696_v41, %v2406_v37  ;;  %v860_v2 = vsel %vm739_vm1, %v859_v52, %v788_v50 }
 0x114   : > { %v920_v53 = vsel %vm739_vm1, 0.0, %v919_v43  ;;  %v941_v57 = vrot.slane %v924_v44, 4  ;;  %v2462_v58 = vperm.slane %v824_v46, %v2410_v49  ;;  %v2465_v60 = vrot.slane %v834_v47, 4 }
 0x115   : > { %v928_v56 = vperm.slane %v920_v53, %v2406_v37  ;;  %v930_v59 = vsel %vm739_vm1, 0.0, %v929_v48  ;;  %v835_v3 = vrot.slane %v2458_v54, 4  ;;  %v838_v4 = vsel %vm739_vm1, 0.0, %v837_v55 }
 0x116   : > { %v938_v0 = vperm.slane %v930_v59, %v2406_v37  ;;  %v939_v5 = vrot.slane %v934_v62, 4  ;;  %v942_v6 = vsel %vm739_vm1, %v934_v62, %v941_v57  ;;  %v839_v8 = vrot.slane %v2462_v58, 4 }
 0x117   : > { %v953_v61 = vrot.slane %v928_v56, 4  ;;  %v950_v9 = vperm.slane %v942_v6, %v2410_v49  ;;  %v842_v12 = vsel %vm739_vm1, 0.0, %v2465_v60  ;;  %v864_v16 = vperm.slane %v860_v2, %v2406_v37 }
 0x118   : > { %v951_v10 = vrot.slane %v938_v0, 4  ;;  %v940_v14 = vsel %vm739_vm1, %v939_v5, %v924_v44  ;;  %v886_v18 = vrot.slane %v838_v4, 4  ;;  %v836_v22 = vsel %vm739_vm1, 0.0, %v835_v3 }
 0x119   : > { %v954_v11 = vsel %vm739_vm1, %v938_v0, %v953_v61  ;;  %v946_v19 = vperm.slane %v940_v14, %v2410_v49  ;;  %v965_v21 = vrot.slane %v950_v9, 4  ;;  %v854_v25 = vsel %vm739_vm1, %v2434_v17, %v2430_v13 }
 0x11a   : > { %v962_v15 = vperm.slane %v954_v11, %v2410_v49  ;;  %v952_v20 = vsel %vm739_vm1, %v951_v10, %v928_v56  ;;  %v897_v26 = vrot.slane %v842_v12, 4  ;;  %v865_v30 = vrot.slane %v853_v1, 4 }
 0x11b   : > { %v958_v23 = vperm.slane %v952_v20, %v2410_v49  ;;  %v963_v27 = vrot.slane %v946_v19, 4  ;;  %v966_v29 = vsel %vm739_vm1, 0.0, %v965_v21  ;;  %v871_v34 = vrot.slane %v864_v16, 4 }
 0x11c   : > { %v969_v24 = vrot.slane %v962_v15, 4  ;;  %v976_v33 = vrot.slane %v966_v29, 4  ;;  %v840_v38 = vsel %vm739_vm1, 0.0, %v839_v8  ;;  %v887_v39 = vsel %vm739_vm1, %v886_v18, %v836_v22  ;;  %v635_v29 = vld [vmem:[#allocation10 + $0x138] sm:$0xff] }
 0x11d   : > { %v967_v31 = vrot.slane %v958_v23, 4  ;;  %v964_v35 = vsel %vm739_vm1, 0.0, %v963_v27  ;;  %v971_v13 = vsel %vm739_vm1, %v965_v21, %v946_v19  ;;  %v858_v41 = vperm.slane %v854_v25, %v2406_v37  ;;  %v643_v25 = vld [vmem:[#allocation10 + $0x178] sm:$0xff]  ;;  %v634_v27 = vld [vmem:[#allocation10 + $0x130] sm:$0xff] }
 0x11e   : > { %v970_v32 = vsel %vm739_vm1, 0.0, %v969_v24  ;;  %v977_v17 = vsel %vm739_vm1, %v976_v33, %v964_v35  ;;  %v982_v43 = vsel %vm739_vm1, %v969_v24, %v958_v23  ;;  %v866_v45 = vsel %vm739_vm1, %v865_v30, %v847_v63  ;;  %v642_v23 = vld [vmem:[#allocation10 + $0x170] sm:$0xff]  ;;  %722 = vmatpush.msrb.mxu3 %v643_v25  ;;  %v627_v33 = vld [vmem:[#allocation10 + $0xf8] sm:$0xff] }
 0x11f   : > { %v987_v36 = vrot.slane %v970_v32, 4  ;;  %v968_v40 = vsel %vm739_vm1, 0.0, %v967_v31  ;;  %v981_v42 = vperm.slane %v977_v17, %v2406_v37  ;;  %v872_v47 = vsel %vm739_vm1, %v871_v34, %v858_v41  ;;  %v638_v24 = vld [vmem:[#allocation10 + $0x150] sm:$0xff]  ;;  %702 = vmatpush.msrb.mxu2 %v642_v23  ;;  %v631_v31 = vld [vmem:[#allocation10 + $0x118] sm:$0xff] }
 0x120   : > { %v891_v48 = vperm.slane %v887_v39, %v2406_v37  ;;  %v898_v50 = vsel %vm739_vm1, %v897_v26, %v840_v38  ;;  %v975_v51 = vperm.slane %v971_v13, %v2406_v37  ;;  %v986_v56 = vperm.slane %v982_v43, %v2406_v37  ;;  %v639_v26 = vld [vmem:[#allocation10 + $0x158] sm:$0xff]  ;;  %v630_v30 = vld [vmem:[#allocation10 + $0x110] sm:$0xff] }
 0x121   : > { %v988_v44 = vsel %vm739_vm1, %v987_v36, %v968_v40  ;;  %v993_v52 = vrot.slane %v981_v42, 4  ;;  %v902_v53 = vperm.slane %v898_v50, %v2406_v37  ;;  %v881_v59 = vsel %vm739_vm1, %v837_v55, %v2458_v54  ;;  %703 = vmatpush.msrb.mxu2 %v638_v24  ;;  %723 = vmatpush.msrb.mxu3 %v639_v26  ;;  %v626_v32 = vld [vmem:[#allocation10 + $0xf0] sm:$0xff]  ;;  %v623_v35 = vld [vmem:[#allocation10 + $0xd8] sm:$0xff] }
 0x122   : > { %v992_v46 = vperm.slane %v988_v44, %v2406_v37  ;;  %v870_v62 = vperm.slane %v866_v45, %v2410_v49  ;;  %v876_v63 = vperm.slane %v872_v47, %v2410_v49  ;;  %v892_v2 = vsel %vm739_vm1, %v2465_v60, %v2462_v58  ;;  %v622_v34 = vld [vmem:[#allocation10 + $0xd0] sm:$0xff]  ;;  %v619_v38 = vld [vmem:[#allocation10 + $0xb8] sm:$0xff] }
 0x123   : > { %v994_v61 = vsel %vm739_vm1, %v993_v52, %v975_v51  ;;  %v903_v3 = vrot.slane %v891_v48, 4  ;;  %v909_v5 = vrot.slane %v902_v53, 4  ;;  %v885_v54 = vperm.slane %v881_v59, %v2406_v37  ;;  %704 = vmatpush.msrb.mxu2 %v634_v27  ;;  %724 = vmatpush.msrb.mxu3 %v635_v29  ;;  %v618_v36 = vld [vmem:[#allocation10 + $0xb0] sm:$0xff]  ;;  %v615_v40 = vld [vmem:[#allocation10 + $0x98] sm:$0xff] }
 0x124   : > { %v999_v57 = vrot.slane %v992_v46, 4  ;;  %v998_v0 = vperm.slane %v994_v61, %v2410_v49  ;;  %v879_v8 = vrot.slane %v870_v62, 4  ;;  %v896_v9 = vperm.slane %v892_v2, %v2406_v37  ;;  %v614_v39 = vld [vmem:[#allocation10 + $0x90] sm:$0xff]  ;;  %v611_v41 = vld [vmem:[#allocation10 + $0x78] sm:$0xff] }
 0x125   : > { %v877_v11 = vrot.slane %v876_v63, 4  ;;  %v904_v12 = vsel %vm739_vm1, %v903_v3, %v885_v54  ;;  %705 = vmatpush.msrb.mxu2 %v630_v30  ;;  %725 = vmatpush.msrb.mxu3 %v631_v31  ;;  %v610_v17 = vld [vmem:[#allocation10 + $0x70] sm:$0xff]  ;;  %v607_v44 = vld [vmem:[#allocation10 + $0x58] sm:$0xff] }
 0x126   : > { %v1000_v1 = vsel %vm739_vm1, %v999_v57, %v986_v56  ;;  %v1007_v6 = vrot.slane %v998_v0, 4  ;;  %v910_v58 = vsel %vm739_vm1, %v909_v5, %v896_v9  ;;  %v880_v60 = vsel %vm739_vm1, %v876_v63, %v879_v8  ;;  %v606_v43 = vld [vmem:[#allocation10 + $0x50] sm:$0xff]  ;;  %v603_v47 = vld [vmem:[#allocation10 + $0x38] sm:$0xff] }
 0x127   : > { %v1004_v4 = vperm.slane %v1000_v1, %v2410_v49  ;;  %v908_v15 = vperm.slane %v904_v12, %v2410_v49  ;;  %v878_v16 = vsel %vm739_vm1, %v877_v11, %v870_v62  ;;  %v914_v18 = vperm.slane %v910_v58, %v2410_v49  ;;  %706 = vmatpush.msrb.mxu2 %v626_v32  ;;  %v602_v46 = vld [vmem:[#allocation10 + $0x30] sm:$0xff]  ;;  %v599_v50 = vld [vmem:[#allocation10 + $0x18] sm:$0xff] }
 0x128   : > { %726 = vmatpush.msrb.mxu3 %v627_v33  ;;  %v598_v48 = vld [vmem:[#allocation10 + $0x10] sm:$0xff]  ;;  %v648_v12 = vperm.slane %v2424_v7, 2 }
 0x129   : > { %v1005_v55 = vrot.slane %v1004_v4, 4  ;;  %v1008_v10 = vsel %vm739_vm1, %v1004_v4, %v1007_v6  ;;  %v917_v19 = vrot.slane %v908_v15, 4  ;;  %v915_v20 = vrot.slane %v914_v18, 4  ;;  %707 = vmatpush.msrb.mxu2 %v622_v34 }
 0x12a   : > { %1137 = vmatpush.xpose.msra.mxu1 %v1008_v10  ;;  %727 = vmatpush.msrb.mxu3 %v623_v35 }
 0x12b   : > { %v1006_v14 = vsel %vm739_vm1, %v1005_v55, %v998_v0  ;;  %v918_v21 = vsel %vm739_vm1, %v914_v18, %v917_v19  ;;  %v916_v22 = vsel %vm739_vm1, %v915_v20, %v908_v15  ;;  %708 = vmatpush.msrb.mxu2 %v618_v36 }
 0x12c   : > { %1114 = vmatpush.xpose.msra.mxu0 %v1006_v14  ;;  %728 = vmatpush.msrb.mxu3 %v619_v38  ;;  %v649_v14 = vperm.slane %v2424_v7, 3 }
 0x12d   : > { %1138 = vmatmul.f32.vlgmr.msra.gmra.mxu1 %v880_v60  ;;  %709 = vmatpush.msrb.mxu2 %v614_v39 }
 0x12e   : > { %729 = vmatpush.msrb.mxu3 %v615_v40 }
 0x12f   : > { %1115 = vmatmul.f32.vlgmr.msra.gmra.mxu0 %v878_v16  ;;  %710 = vmatpush.msrb.mxu2 %v610_v17 }
 0x130   : > { %730 = vmatpush.msrb.mxu3 %v611_v41 }
 0x131   : > { %711 = vmatpush.msrb.mxu2 %v606_v43 }
 0x132   : > { %731 = vmatpush.msrb.mxu3 %v607_v44 }
 0x133   : > { %712 = vmatpush.msrb.mxu2 %v602_v46 }
 0x134   : > { %732 = vmatpush.msrb.mxu3 %v603_v47 }
 0x135   : > { %1141 = vmatmul.f32.gmra.mxu1 %v918_v21  ;;  %713 = vmatpush.msrb.mxu2 %v598_v48 }
 0x136   : > { %733 = vmatpush.msrb.mxu3 %v599_v50  ;;  %1766 = vmatmul.msk.f32.vlgmr.msrb.gmra.mxu2 %vm654_vm0, %v2400_v28 }
 0x137   : > { %1118 = vmatmul.f32.gmra.mxu0 %v916_v22  ;;  %1767 = vmatmul.msk.f32.vlgmr.msrb.gmra.mxu3 %vm654_vm0, %v2400_v28 }
 0x1aa   : > { %v1139_v45 = vpop.f32.mrf.mxu1 }
 0x1ab   : > { %v1152_v52 = vsel %vm1145_vm2, %v1139_v45, -inf }
 0x1ac   : > { %v1116_v13 = vpop.f32.mrf.mxu0 }
 0x1ad   : > { %v1146_v42 = vsel %vm1145_vm2, %v1116_v13, -inf }
 0x1ae   : > { %1147 = vmax.xlane.f32.xlu0 %v1146_v42 }
 0x1b2   : > { %v1142_v56 = vpop.f32.mrf.mxu1 }
 0x1b3   : > { %v1155_v57 = vsel %vm1145_vm2, %v1142_v56, -inf }
 0x1b4   : > { %v1119_v51 = vpop.f32.mrf.mxu0 }
 0x1b5   : > { %v1149_v53 = vsel %vm1145_vm2, %v1119_v51, -inf }
 0x1b6   : > { %1153 = vmax.xlane.f32.xlu0 %v1152_v52  ;;  %1150 = vmax.xlane.f32.xlu1 %v1149_v53 }
 0x1b9   : > { %v715_v58 = vpop.f32.mrf.mxu2 }
 0x1ba   : > { %v735_v60 = vpop.f32.mrf.mxu3  ;;  %v716_v15 = vadd.f32 %v715_v58, %v648_v12 }
 0x1bb   : > { %v736_v16 = vadd.f32 %v735_v60, %v649_v14 }
 0x1bc   : > { %v1009_v20 = vrot.slane %v716_v15, 4  ;;  %v1014_v21 = vperm.slane %v716_v15, %v2406_v37 }
 0x1bd   : > { %v1019_v22 = vrot.slane %v736_v16, 4  ;;  %v1024_v23 = vperm.slane %v736_v16, %v2406_v37 }
 0x1be   : > { %1156 = vmax.xlane.f32.xlu1 %v1155_v57  ;;  %v1010_v24 = vsel %vm739_vm1, 0.0, %v1009_v20  ;;  %v1031_v25 = vrot.slane %v1014_v21, 4 }
 0x1bf   : > { %v1020_v7 = vsel %vm739_vm1, 0.0, %v1019_v22  ;;  %v1018_v26 = vperm.slane %v1010_v24, %v2406_v37  ;;  %v1029_v29 = vrot.slane %v1024_v23, 4  ;;  %v1491_v22 = vld [vmem:[#allocation11 + $0x1f8] sm:$0xff]  ;;  %v1488_v24 = vld [vmem:[#allocation11 + $0x1e0] sm:$0xff] }
 0x1c0   : > { %v1028_v27 = vperm.slane %v1020_v7, %v2406_v37  ;;  %v1032_v30 = vsel %vm739_vm1, %v1024_v23, %v1031_v25  ;;  %v1458_v23 = vld [vmem:[#allocation11 + $0xf0] sm:$0xff]  ;;  %v1489_v25 = vld [vmem:[#allocation11 + $0x1e8] sm:$0xff] }
 0x1c1   : > { %v1043_v31 = vrot.slane %v1018_v26, 4  ;;  %v1030_v32 = vsel %vm739_vm1, %v1029_v29, %v1014_v21  ;;  %v1040_v33 = vperm.slane %v1032_v30, %v2410_v49  ;;  %v1490_v21 = vld [vmem:[#allocation11 + $0x1f0] sm:$0xff]  ;;  %1498 = vmatpush.msrb.mxu0 %v1458_v23  ;;  %v1455_v30 = vld [vmem:[#allocation11 + $0xd8] sm:$0xff] }
 0x1c2   : > { %v1041_v34 = vrot.slane %v1028_v27, 4  ;;  %v1036_v35 = vperm.slane %v1030_v32, %v2410_v49  ;;  %1521 = vmatpush.msrb.mxu1 %v1490_v21  ;;  %v1486_v7 = vld [vmem:[#allocation11 + $0x1d0] sm:$0xff]  ;;  %v1452_v32 = vld [vmem:[#allocation11 + $0xc0] sm:$0xff] }
 0x1c3   : > { %v1044_v38 = vsel %vm739_vm1, %v1028_v27, %v1043_v31  ;;  %v1055_v39 = vrot.slane %v1040_v33, 4  ;;  %v1487_v27 = vld [vmem:[#allocation11 + $0x1d8] sm:$0xff]  ;;  %v1454_v29 = vld [vmem:[#allocation11 + $0xd0] sm:$0xff]  ;;  %v1485_v31 = vld [vmem:[#allocation11 + $0x1c8] sm:$0xff] }
 0x1c4   : > { %v1042_v36 = vsel %vm739_vm1, %v1041_v34, %v1018_v26  ;;  %v1053_v17 = vrot.slane %v1036_v35, 4  ;;  %v1457_v26 = vld [vmem:[#allocation11 + $0xe8] sm:$0xff]  ;;  %1522 = vmatpush.msrb.mxu1 %v1488_v24  ;;  %v1482_v33 = vld [vmem:[#allocation11 + $0x1b0] sm:$0xff] }
 0x1c5   : > { %v1048_v40 = vperm.slane %v1042_v36, %v2410_v49  ;;  %v1056_v41 = vsel %vm739_vm1, 0.0, %v1055_v39  ;;  %v1061_v46 = vsel %vm739_vm1, %v1055_v39, %v1036_v35  ;;  %v1453_v34 = vld [vmem:[#allocation11 + $0xc8] sm:$0xff]  ;;  %v1483_v35 = vld [vmem:[#allocation11 + $0x1b8] sm:$0xff]  ;;  %v1450_v36 = vld [vmem:[#allocation11 + $0xb0] sm:$0xff] }
 0x1c6   : > { %v1054_v42 = vsel %vm739_vm1, 0.0, %v1053_v17  ;;  %1523 = vmatpush.msrb.mxu1 %v1486_v7  ;;  %v1451_v39 = vld [vmem:[#allocation11 + $0xb8] sm:$0xff]  ;;  %v1478_v17 = vld [vmem:[#allocation11 + $0x190] sm:$0xff] }
 0x1c7   : > { %v1057_v43 = vrot.slane %v1048_v40, 4  ;;  %v1430_v21 = vld [vmem:[#allocation11 + $0x10] sm:$0xff] }
 0x1c9   : > { %v1058_v47 = vsel %vm739_vm1, 0.0, %v1057_v43  ;;  %v1446_v43 = vld [vmem:[#allocation11 + $0x90] sm:$0xff] }
 0x221   : > { %v1148_v59 = vpop.xlane.xlu0 %1147 }
 0x222   : > { %v1158_v61 = vsub.f32 %v1116_v13, %v1148_v59  ;;  %v1052_v13 = vperm.slane %v1044_v38, %v2410_v49  ;;  %v1480_v38 = vld [vmem:[#allocation11 + $0x1a0] sm:$0xff] }
 0x224   : > { %v1162_v62 = vmul.f32 1.442695, %v1158_v61  ;;  %v1059_v44 = vrot.slane %v1052_v13, 4  ;;  %v1448_v13 = vld [vmem:[#allocation11 + $0xa0] sm:$0xff] }
 0x226   : > { %1879 = vpow2.f32 %v1162_v62  ;;  %v1060_v48 = vsel %vm739_vm1, 0.0, %v1059_v44 }
 0x227   : > { %v1077_v52 = vrot.slane %v1060_v48, 4  ;;  %v1474_v48 = vld [vmem:[#allocation11 + $0x170] sm:$0xff] }
 0x229   : > { %v1154_v63 = vpop.xlane.xlu0 %1153  ;;  %v1151_v0 = vpop.xlane.xlu1 %1150  ;;  %v1078_v57 = vsel %vm739_vm1, %v1077_v52, %v1058_v47  ;;  %v1444_v47 = vld [vmem:[#allocation11 + $0x80] sm:$0xff]  ;;  %v1442_v52 = vld [vmem:[#allocation11 + $0x70] sm:$0xff] }
 0x22a   : > { %v1160_v1 = vsub.f32 %v1139_v45, %v1154_v63  ;;  %v1159_v2 = vsub.f32 %v1119_v51, %v1151_v0  ;;  %v1066_v45 = vrot.slane %v1056_v41, 4  ;;  %v1072_v51 = vsel %vm739_vm1, %v1059_v44, %v1048_v40  ;;  %v1481_v40 = vld [vmem:[#allocation11 + $0x1a8] sm:$0xff]  ;;  %v1476_v44 = vld [vmem:[#allocation11 + $0x180] sm:$0xff] }
 0x22b   : > { %v1076_v61 = vperm.slane %v1072_v51, %v2406_v37  ;;  %v1082_v62 = vperm.slane %v1078_v57, %v2406_v37  ;;  %v1449_v41 = vld [vmem:[#allocation11 + $0xa8] sm:$0xff]  ;;  %v1475_v51 = vld [vmem:[#allocation11 + $0x178] sm:$0xff] }
 0x22c   : > { %v2541_v3 = vpop.eup %1879  ;;  %v1166_v4 = vmul.f32 1.442695, %v1160_v1  ;;  %v1164_v5 = vmul.f32 1.442695, %v1159_v2  ;;  %v1067_v50 = vsel %vm739_vm1, %v1066_v45, %v1054_v42  ;;  %v1479_v42 = vld [vmem:[#allocation11 + $0x198] sm:$0xff]  ;;  %v1473_v57 = vld [vmem:[#allocation11 + $0x168] sm:$0xff] }
 0x22d   : > { %v1170_v6 = vsel %vm1145_vm2, %v2541_v3, 0.0  ;;  %v1071_v53 = vperm.slane %v1067_v50, %v2406_v37  ;;  %v1089_v0 = vrot.slane %v1082_v62, 4  ;;  %v1447_v45 = vld [vmem:[#allocation11 + $0x98] sm:$0xff]  ;;  %v1445_v50 = vld [vmem:[#allocation11 + $0x88] sm:$0xff] }
 0x22e   : > { %1881 = vpow2.f32 %v1166_v4  ;;  %1171 = vadd.xlane.f32.xlu2 %v1170_v6  ;;  %v1441_v62 = vld [vmem:[#allocation11 + $0x68] sm:$0xff] }
 0x22f   : > { %1883 = vpow2.f32 %v1164_v5  ;;  %v1083_v59 = vrot.slane %v1071_v53, 4  ;;  %v1090_v1 = vsel %vm739_vm1, %v1089_v0, %v1076_v61  ;;  %v1472_v53 = vld [vmem:[#allocation11 + $0x160] sm:$0xff]  ;;  %v1470_v61 = vld [vmem:[#allocation11 + $0x150] sm:$0xff] }
 0x230   : > { %v1094_v4 = vperm.slane %v1090_v1, %v2410_v49  ;;  %v1438_v0 = vld [vmem:[#allocation11 + $0x50] sm:$0xff] }
 0x231   : > { %v1157_v28 = vpop.xlane.xlu1 %1156 }
 0x232   : > { %v1161_v54 = vsub.f32 %v1142_v56, %v1157_v28  ;;  %v1065_v56 = vperm.slane %v1061_v46, %v2406_v37  ;;  %v1095_v5 = vrot.slane %v1094_v4, 4  ;;  %v1477_v46 = vld [vmem:[#allocation11 + $0x188] sm:$0xff] }
 0x234   : > { %v2545_v55 = vpop.eup %1881  ;;  %v1168_v8 = vmul.f32 1.442695, %v1161_v54  ;;  %v1084_v63 = vsel %vm739_vm1, %v1083_v59, %v1065_v56  ;;  %v1443_v56 = vld [vmem:[#allocation11 + $0x78] sm:$0xff]  ;;  %v1440_v59 = vld [vmem:[#allocation11 + $0x60] sm:$0xff] }
 0x235   : > { %v2547_v9 = vpop.eup %1883  ;;  %v1176_v10 = vsel %vm1145_vm2, %v2545_v55, 0.0  ;;  %v1088_v2 = vperm.slane %v1084_v63, %v2410_v49  ;;  %v1471_v63 = vld [vmem:[#allocation11 + $0x158] sm:$0xff] }
 0x236   : > { %1885 = vpow2.f32 %v1168_v8  ;;  %1177 = vadd.xlane.f32.xlu2 %v1176_v10  ;;  %v1173_v11 = vsel %vm1145_vm2, %v2547_v9, 0.0 }
 0x237   : > { %1174 = vadd.xlane.f32.xlu0 %v1173_v11  ;;  %v1096_v6 = vsel %vm739_vm1, %v1095_v5, %v1088_v2  ;;  %v1097_v28 = vrot.slane %v1088_v2, 4  ;;  %v1468_v2 = vld [vmem:[#allocation11 + $0x140] sm:$0xff]  ;;  %v1469_v5 = vld [vmem:[#allocation11 + $0x148] sm:$0xff] }
 0x238   : > { %1211 = vmatpush.msra.mxu2 %v1096_v6 }
 0x239   : > { %v1098_v54 = vsel %vm739_vm1, %v1094_v4, %v1097_v28  ;;  %v1439_v4 = vld [vmem:[#allocation11 + $0x58] sm:$0xff]  ;;  %v1436_v28 = vld [vmem:[#allocation11 + $0x40] sm:$0xff] }
 0x23a   : > { %1240 = vmatpush.msra.mxu3 %v1098_v54  ;;  %v1466_v54 = vld [vmem:[#allocation11 + $0x130] sm:$0xff] }
 0x23c   : > { %v2555_v18 = vpop.eup %1885  ;;  %1567 = vmatpush.msrb.mxu3 %v1491_v22  ;;  %v1460_v22 = vld [vmem:[#allocation11 + $0x100] sm:$0xff] }
 0x23d   : > { %v1179_v19 = vsel %vm1145_vm2, %v2555_v18, 0.0 }
 0x23e   : > { %1180 = vadd.xlane.f32.xlu1 %v1179_v19  ;;  %1568 = vmatpush.msrb.mxu3 %v1489_v25  ;;  %v1461_v25 = vld [vmem:[#allocation11 + $0x108] sm:$0xff] }
 0x240   : > { %1569 = vmatpush.msrb.mxu3 %v1487_v27 }
 0x242   : > { %1570 = vmatpush.msrb.mxu3 %v1485_v31 }
 0x244   : > { %1571 = vmatpush.msrb.mxu3 %v1483_v35 }
 0x246   : > { %1572 = vmatpush.msrb.mxu3 %v1481_v40 }
 0x248   : > { %1573 = vmatpush.msrb.mxu3 %v1479_v42 }
 0x24a   : > { %1574 = vmatpush.msrb.mxu3 %v1477_v46 }
 0x24c   : > { %1575 = vmatpush.msrb.mxu3 %v1475_v51 }
 0x24e   : > { %1576 = vmatpush.msrb.mxu3 %v1473_v57 }
 0x250   : > { %1577 = vmatpush.msrb.mxu3 %v1471_v63 }
 0x252   : > { %1578 = vmatpush.msrb.mxu3 %v1469_v5 }
 0x2a1   : > { %v1172_v8 = vpop.xlane.xlu2 %1171 }
 0x2a2   : > { %1887 = vrcp.f32 %v1172_v8  ;;  %v1437_v8 = vld [vmem:[#allocation11 + $0x48] sm:$0xff] }
 0x2a8   : > { %v1888_v10 = vpop.eup %1887 }
 0x2a9   : > { %v1186_v11 = vmul.f32 %v1888_v10, %v2541_v3  ;;  %v1178_v12 = vpop.xlane.xlu2 %1177  ;;  %v1467_v10 = vld [vmem:[#allocation11 + $0x138] sm:$0xff] }
 0x2aa   : > { %1889 = vrcp.f32 %v1178_v12  ;;  %v1175_v14 = vpop.xlane.xlu0 %1174  ;;  %v1464_v12 = vld [vmem:[#allocation11 + $0x120] sm:$0xff]  ;;  %1579 = vmatpush.msrb.mxu3 %v1467_v10 }
 0x2ab   : > { %1891 = vrcp.f32 %v1175_v14  ;;  %1768 = vmatmul.msk.f32.vlgmr.msra.gmra.mxu2 %vm1145_vm2, %v1186_v11  ;;  %v1434_v11 = vld [vmem:[#allocation11 + $0x30] sm:$0xff]  ;;  %v1435_v14 = vld [vmem:[#allocation11 + $0x38] sm:$0xff] }
 0x2b0   : > { %v1890_v58 = vpop.eup %1889 }
 0x2b1   : > { %v1892_v60 = vpop.eup %1891  ;;  %v1188_v15 = vmul.f32 %v1890_v58, %v2545_v55  ;;  %v1181_v16 = vpop.xlane.xlu1 %1180  ;;  %v1459_v55 = vld [vmem:[#allocation11 + $0xf8] sm:$0xff]  ;;  %v1465_v58 = vld [vmem:[#allocation11 + $0x128] sm:$0xff] }
 0x2b2   : > { %1893 = vrcp.f32 %v1181_v16  ;;  %v1187_v19 = vmul.f32 %v1892_v60, %v2547_v9  ;;  %1544 = vmatpush.msrb.mxu2 %v1459_v55  ;;  %v1456_v9 = vld [vmem:[#allocation11 + $0xe0] sm:$0xff]  ;;  %1580 = vmatpush.msrb.mxu3 %v1465_v58  ;;  %v1431_v55 = vld [vmem:[#allocation11 + $0x18] sm:$0xff] }
 0x2b3   : > { %1770 = vmatmul.msk.f32.vlgmr.msra.gmra.mxu3 %vm1145_vm2, %v1188_v15  ;;  %1499 = vmatpush.msrb.mxu0 %v1456_v9  ;;  %v1432_v16 = vld [vmem:[#allocation11 + $0x20] sm:$0xff] }
 0x2b4   : > { %1769 = vmatmul.msk.f32.gmra.mxu2 %vm1145_vm2, %v1187_v19  ;;  %v1462_v19 = vld [vmem:[#allocation11 + $0x110] sm:$0xff] }
 0x2b5   : > { %1545 = vmatpush.msrb.mxu2 %v1457_v26  ;;  %1500 = vmatpush.msrb.mxu0 %v1454_v29  ;;  %v1428_v29 = vld [vmem:[#allocation11] sm:$0xff] }
 0x2b7   : > { %1546 = vmatpush.msrb.mxu2 %v1455_v30  ;;  %1501 = vmatpush.msrb.mxu0 %v1452_v32  ;;  %v1429_v30 = vld [vmem:[#allocation11 + $0x8] sm:$0xff] }
 0x2b8   : > { %v1894_v20 = vpop.eup %1893 }
 0x2b9   : > { %v1189_v3 = vmul.f32 %v1894_v20, %v2555_v18  ;;  %v1484_v18 = vld [vmem:[#allocation11 + $0x1c0] sm:$0xff]  ;;  %1547 = vmatpush.msrb.mxu2 %v1453_v34  ;;  %1502 = vmatpush.msrb.mxu0 %v1450_v36  ;;  %v1433_v20 = vld [vmem:[#allocation11 + $0x28] sm:$0xff] }
 0x2ba   : > { %1524 = vmatpush.msrb.mxu1 %v1484_v18 }
 0x2bb   : > { %1771 = vmatmul.msk.f32.gmra.mxu3 %vm1145_vm2, %v1189_v3  ;;  %1548 = vmatpush.msrb.mxu2 %v1451_v39  ;;  %v1463_v3 = vld [vmem:[#allocation11 + $0x118] sm:$0xff] }
 0x2bc   : > { %1525 = vmatpush.msrb.mxu1 %v1482_v33  ;;  %1503 = vmatpush.msrb.mxu0 %v1448_v13 }
 0x2bd   : > { %1549 = vmatpush.msrb.mxu2 %v1449_v41  ;;  %1581 = vmatpush.msrb.mxu3 %v1463_v3 }
 0x2be   : > { %1526 = vmatpush.msrb.mxu1 %v1480_v38  ;;  %1504 = vmatpush.msrb.mxu0 %v1446_v43 }
 0x2bf   : > { %1550 = vmatpush.msrb.mxu2 %v1447_v45  ;;  %1582 = vmatpush.msrb.mxu3 %v1461_v25 }
 0x2c0   : > { %1527 = vmatpush.msrb.mxu1 %v1478_v17  ;;  %1505 = vmatpush.msrb.mxu0 %v1444_v47 }
 0x2c1   : > { %1551 = vmatpush.msrb.mxu2 %v1445_v50 }
 0x2c2   : > { %1528 = vmatpush.msrb.mxu1 %v1476_v44  ;;  %1506 = vmatpush.msrb.mxu0 %v1442_v52 }
 0x2c3   : > { %1552 = vmatpush.msrb.mxu2 %v1443_v56 }
 0x2c4   : > { %1529 = vmatpush.msrb.mxu1 %v1474_v48  ;;  %1507 = vmatpush.msrb.mxu0 %v1440_v59 }
 0x2c5   : > { %1553 = vmatpush.msrb.mxu2 %v1441_v62 }
 0x2c6   : > { %1530 = vmatpush.msrb.mxu1 %v1472_v53  ;;  %1508 = vmatpush.msrb.mxu0 %v1438_v0 }
 0x2c7   : > { %1554 = vmatpush.msrb.mxu2 %v1439_v4 }
 0x2c8   : > { %1531 = vmatpush.msrb.mxu1 %v1470_v61  ;;  %1509 = vmatpush.msrb.mxu0 %v1436_v28 }
 0x2c9   : > { %1555 = vmatpush.msrb.mxu2 %v1437_v8 }
 0x2ca   : > { %1532 = vmatpush.msrb.mxu1 %v1468_v2  ;;  %1510 = vmatpush.msrb.mxu0 %v1434_v11 }
 0x2cb   : > { %1556 = vmatpush.msrb.mxu2 %v1435_v14 }
 0x2cc   : > { %1533 = vmatpush.msrb.mxu1 %v1466_v54  ;;  %1511 = vmatpush.msrb.mxu0 %v1432_v16 }
 0x2cd   : > { %1557 = vmatpush.msrb.mxu2 %v1433_v20 }
 0x2ce   : > { %1534 = vmatpush.msrb.mxu1 %v1464_v12  ;;  %1512 = vmatpush.msrb.mxu0 %v1430_v21 }
 0x2cf   : > { %1558 = vmatpush.msrb.mxu2 %v1431_v55 }
 0x2d0   : > { %1535 = vmatpush.msrb.mxu1 %v1462_v19  ;;  %1513 = vmatpush.msrb.mxu0 %v1428_v29 }
 0x2d1   : > { %1559 = vmatpush.msrb.mxu2 %v1429_v30 }
 0x2d2   : > { %1536 = vmatpush.msrb.mxu1 %v1460_v22 }
 0x32e   : > { %v1213_v1 = vpop.f32.mrf.mxu2 }
 0x32f   : > { %v1248_v6 = vrot.slane %v1213_v1, 4  ;;  %v1253_v15 = vperm.slane %v1213_v1, %v2406_v37 }
 0x331   : > { %v1249_v60 = vsel %vm739_vm1, 0.0, %v1248_v6  ;;  %v1270_v9 = vrot.slane %v1253_v15, 4 }
 0x332   : > { %v1257_v23 = vperm.slane %v1249_v60, %v2406_v37 }
 0x334   : > { %v1282_v34 = vrot.slane %v1257_v23, 4 }
 0x336   : > { %v1242_v24 = vpop.f32.mrf.mxu3 }
 0x337   : > { %v1216_v7 = vpop.f32.mrf.mxu2  ;;  %v1258_v26 = vrot.slane %v1242_v24, 4  ;;  %v1263_v27 = vperm.slane %v1242_v24, %v2406_v37 }
 0x338   : > { %v1300_v18 = vrot.slane %v1216_v7, 4  ;;  %v1305_v39 = vperm.slane %v1216_v7, %v2406_v37 }
 0x339   : > { %v1259_v31 = vsel %vm739_vm1, 0.0, %v1258_v26  ;;  %v1268_v32 = vrot.slane %v1263_v27, 4  ;;  %v1271_v33 = vsel %vm739_vm1, %v1263_v27, %v1270_v9 }
 0x33a   : > { %v1301_v35 = vsel %vm739_vm1, 0.0, %v1300_v18  ;;  %v1267_v36 = vperm.slane %v1259_v31, %v2406_v37  ;;  %v1279_v38 = vperm.slane %v1271_v33, %v2410_v49  ;;  %v1322_v51 = vrot.slane %v1305_v39, 4 }
 0x33b   : > { %v1309_v40 = vperm.slane %v1301_v35, %v2406_v37  ;;  %v1269_v13 = vsel %vm739_vm1, %v1268_v32, %v1253_v15 }
 0x33c   : > { %v1275_v17 = vperm.slane %v1269_v13, %v2410_v49  ;;  %v1280_v41 = vrot.slane %v1267_v36, 4  ;;  %v1283_v42 = vsel %vm739_vm1, %v1267_v36, %v1282_v34  ;;  %v1294_v43 = vrot.slane %v1279_v38, 4 }
 0x33d   : > { %v1291_v44 = vperm.slane %v1283_v42, %v2410_v49  ;;  %v1334_v57 = vrot.slane %v1309_v40, 4 }
 0x33e   : > { %v1281_v45 = vsel %vm739_vm1, %v1280_v41, %v1257_v23  ;;  %v1292_v46 = vrot.slane %v1275_v17, 4  ;;  %v1295_v47 = vsel %vm739_vm1, 0.0, %v1294_v43  ;;  %v1352_v48 = vsel %vm739_vm1, %v1294_v43, %v1275_v17  ;;  %v1245_v50 = vpop.f32.mrf.mxu3 }
 0x33f   : > { %v1287_v52 = vperm.slane %v1281_v45, %v2410_v49  ;;  %v1298_v53 = vrot.slane %v1291_v44, 4  ;;  %v1357_v56 = vrot.slane %v1295_v47, 4  ;;  %v1310_v61 = vrot.slane %v1245_v50, 4 }
 0x340   : > { %v1293_v59 = vsel %vm739_vm1, 0.0, %v1292_v46  ;;  %v1315_v62 = vperm.slane %v1245_v50, %v2406_v37  ;;  %v1356_v1 = vperm.slane %v1352_v48, %v2406_v37 }
 0x341   : > { %v1296_v63 = vrot.slane %v1287_v52, 4  ;;  %v1299_v0 = vsel %vm739_vm1, 0.0, %v1298_v53  ;;  %v1358_v2 = vsel %vm739_vm1, %v1357_v56, %v1293_v59  ;;  %v1311_v6 = vsel %vm739_vm1, 0.0, %v1310_v61 }
 0x342   : > { %v1362_v4 = vperm.slane %v1358_v2, %v2406_v37  ;;  %v1368_v5 = vrot.slane %v1299_v0, 4  ;;  %v1320_v28 = vrot.slane %v1315_v62, 4  ;;  %v1319_v8 = vperm.slane %v1311_v6, %v2406_v37 }
 0x343   : > { %v1297_v54 = vsel %vm739_vm1, 0.0, %v1296_v63  ;;  %v1323_v10 = vsel %vm739_vm1, %v1315_v62, %v1322_v51  ;;  %v1363_v11 = vsel %vm739_vm1, %v1298_v53, %v1287_v52 }
 0x344   : > { %v1321_v12 = vsel %vm739_vm1, %v1320_v28, %v1305_v39  ;;  %v1331_v14 = vperm.slane %v1323_v10, %v2410_v49  ;;  %v1369_v58 = vsel %vm739_vm1, %v1368_v5, %v1297_v54  ;;  %v1374_v60 = vrot.slane %v1362_v4, 4 }
 0x345   : > { %v1327_v15 = vperm.slane %v1321_v12, %v2410_v49  ;;  %v1332_v16 = vrot.slane %v1319_v8, 4  ;;  %v1335_v19 = vsel %vm739_vm1, %v1319_v8, %v1334_v57  ;;  %v1373_v20 = vperm.slane %v1369_v58, %v2406_v37 }
 0x346   : > { %v1343_v3 = vperm.slane %v1335_v19, %v2410_v49  ;;  %v1346_v21 = vrot.slane %v1331_v14, 4  ;;  %v1367_v22 = vperm.slane %v1363_v11, %v2406_v37  ;;  %v1375_v23 = vsel %vm739_vm1, %v1374_v60, %v1356_v1 }
 0x347   : > { %v1333_v24 = vsel %vm739_vm1, %v1332_v16, %v1309_v40  ;;  %v1344_v55 = vrot.slane %v1327_v15, 4  ;;  %v1379_v25 = vperm.slane %v1375_v23, %v2410_v49  ;;  %v1380_v9 = vrot.slane %v1373_v20, 4 }
 0x348   : > { %v1339_v7 = vperm.slane %v1333_v24, %v2410_v49  ;;  %v1347_v26 = vsel %vm739_vm1, 0.0, %v1346_v21  ;;  %v1350_v27 = vrot.slane %v1343_v3, 4  ;;  %v1390_v35 = vsel %vm739_vm1, %v1346_v21, %v1327_v15 }
 0x349   : > { %v1345_v29 = vsel %vm739_vm1, 0.0, %v1344_v55  ;;  %v1395_v18 = vrot.slane %v1347_v26, 4  ;;  %v1381_v30 = vsel %vm739_vm1, %v1380_v9, %v1367_v22  ;;  %v1388_v31 = vrot.slane %v1379_v25, 4 }
 0x34a   : > { %v1348_v32 = vrot.slane %v1339_v7, 4  ;;  %v1351_v33 = vsel %vm739_vm1, 0.0, %v1350_v27  ;;  %v1385_v34 = vperm.slane %v1381_v30, %v2410_v49  ;;  %v1401_v41 = vsel %vm739_vm1, %v1350_v27, %v1339_v7 }
 0x34b   : > { %v1406_v36 = vrot.slane %v1351_v33, 4  ;;  %v1396_v38 = vsel %vm739_vm1, %v1395_v18, %v1345_v29  ;;  %v1394_v44 = vperm.slane %v1390_v35, %v2406_v37  ;;  %v1405_v47 = vperm.slane %v1401_v41, %v2406_v37 }
 0x34c   : > { %v1389_v39 = vsel %vm739_vm1, %v1385_v34, %v1388_v31  ;;  %v1386_v40 = vrot.slane %v1385_v34, 4  ;;  %v1349_v13 = vsel %vm739_vm1, 0.0, %v1348_v32  ;;  %v1400_v17 = vperm.slane %v1396_v38, %v2406_v37 }
 0x34d   : > { %1537 = vmatmul.f32.vlgmr.msrb.gmra.mxu1 %v1389_v39  ;;  %1583 = vmatmul.f32.vlgmr.msrb.gmra.mxu3 %v1389_v39  ;;  %v1407_v42 = vsel %vm739_vm1, %v1406_v36, %v1349_v13 }
 0x34e   : > { %v1387_v43 = vsel %vm739_vm1, %v1386_v40, %v1379_v25  ;;  %v1411_v45 = vperm.slane %v1407_v42, %v2406_v37  ;;  %v1412_v46 = vrot.slane %v1400_v17, 4  ;;  %v1492_v37 = vld [vmem:[%s2708_s7] sm:$0x3] }
 0x34f   : > { %1514 = vmatmul.f32.vlgmr.msrb.gmra.mxu0 %v1387_v43  ;;  %1560 = vmatmul.f32.vlgmr.msrb.gmra.mxu2 %v1387_v43  ;;  %v1494_v62 = vperm.slane %v1492_v37, 0  ;;  %v1495_v2 = vperm.slane %v1492_v37, 1 }
 0x350   : > { %v1413_v48 = vsel %vm739_vm1, %v1412_v46, %v1394_v44  ;;  %v1418_v50 = vrot.slane %v1411_v45, 4 }
 0x351   : > { %v1417_v51 = vperm.slane %v1413_v48, %v2410_v49 }
 0x352   : > { %v1419_v52 = vsel %vm739_vm1, %v1418_v50, %v1405_v47 }
 0x353   : > { %v1423_v53 = vperm.slane %v1419_v52, %v2410_v49  ;;  %v1426_v56 = vrot.slane %v1417_v51, 4 }
 0x355   : > { %v1427_v57 = vsel %vm739_vm1, %v1423_v53, %v1426_v56  ;;  %v1424_v59 = vrot.slane %v1423_v53, 4 }
 0x356   : > { %1540 = vmatmul.f32.gmra.mxu1 %v1427_v57  ;;  %1586 = vmatmul.f32.gmra.mxu3 %v1427_v57 }
 0x357   : > { %v1425_v61 = vsel %vm739_vm1, %v1424_v59, %v1417_v51 }
 0x358   : > { %1517 = vmatmul.f32.gmra.mxu0 %v1425_v61  ;;  %1563 = vmatmul.f32.gmra.mxu2 %v1425_v61 }
 0x3ca   : > { %v1538_v0 = vpop.f32.mrf.mxu1 }
 0x3cc   : > { %v1515_v63 = vpop.f32.mrf.mxu0 }
 0x3cd   : > { %v1516_v49 = vadd.f32 %v1515_v63, %v1494_v62 }
 0x3cf   : > { %v1539_v1 = vadd.f32 %v1538_v0, %v1516_v49 }
 0x3d0   : > { %v1584_v5 = vpop.f32.mrf.mxu3 }
 0x3d1   : > { %1590 = vst [vmem:[%s428_s6] sm:$0xff] %v1539_v1 }
 0x3d2   : > { %v1561_v4 = vpop.f32.mrf.mxu2 }
 0x3d3   : > { %v1562_v6 = vadd.f32 %v1561_v4, %v1495_v2  ;;  %v1541_v10 = vpop.f32.mrf.mxu1 }
 0x3d5   : > { %v1585_v28 = vadd.f32 %v1584_v5, %v1562_v6  ;;  %v1518_v54 = vpop.f32.mrf.mxu0 }
 0x3d6   : > { %v1519_v8 = vadd.f32 %v1518_v54, %v1494_v62 }
 0x3d7   : > { %1591 = vst [vmem:[%s428_s6 + $0x8] sm:$0xff] %v1585_v28 }
 0x3d8   : > { %v1542_v11 = vadd.f32 %v1541_v10, %v1519_v8 }
 0x3d9   : > { %v1587_v58 = vpop.f32.mrf.mxu3 }
 0x3da   : > { %1592 = vst [vmem:[%s428_s6 + $0x10] sm:$0xff] %v1542_v11 }
 0x3db   : > { %v1564_v12 = vpop.f32.mrf.mxu2 }
 0x3dc   : > { %v1565_v14 = vadd.f32 %v1564_v12, %v1495_v2 }
 0x3de   : > { %v1588_v60 = vadd.f32 %v1587_v58, %v1565_v14 }
 0x3e0   : > { %1593 = vst [vmem:[%s428_s6 + $0x18] sm:$0xff] %v1588_v60 }
 0x3e1   : > { %2102 = shalt.err (!%p2099_p9)
}
 0x3e2   : > { %s2169_s2 = smov 256   ;;  %s2170_s18 = smov 16  }
 0x3e3   : > { %1799 = dma.vmem_to_hbm [thread:$0]  (%p2306_p3), %s1608_s15, 512, %s1610_s29, %s1595_s9, %s2169_s2, %s2169_s2, %s2170_s18  }
 0x3e4 PF: > { %s1624_s11 = sand.u32 1, %s2145_s27   ;;  %p2734_p12 = scmp.ge.s32.totalorder %s2157_s30, 2 }
 0x3e5   : > { %s1625_s21 = scalar_lea.sflag [#allocation4], %s1624_s11 }
 0x3e6   : > { %p1822_p13 = pnand %p2734_p12, %p2251_p6 }
 0x3e8   : > { %p1823_p0 = pneg %p1822_p13 }
 0x3ea   : > { %2140 = dma.done.wait (%p1823_p0), %s1625_s21, 512  }
 0x3eb   : > { %2142 = vsyncadd (%p1823_p0), %s1625_s21, 4294966784  ;;  %s2735_s30 = sld [smem:[#allocation21_spill]]  ;;  %s2738_s27 = smov %s2149_s28 }
 0x3ec   : > { %s2736_s10 = sld [smem:[#allocation20_spill]] }
 0x3ed   : > { %s2737_s29 = sld [smem:[#allocation22_spill]] }
 0x3f1   : > { %p26_p5 = scmp.ge.s32.totalorder %s2735_s30, 4  }
 0x3f2   : > { %s2739_s28 = smov %s2736_s10 }
 0x3f3   :  { %28 = sbr.rel (!%p26_p5) target bundleno = 14 (0xe), region = 126 }
 0x3f8   :  { %1631 = vsyncpa [#allocation3], 1 }
 0x3f9   :  { %1633 = vsyncpa [#allocation3 + $0x1], 1 }
 0x3fa   :  { %1634 = vsyncpa [#allocation6], 1 }
 0x3fb   :  { %1636 = vsyncpa [#allocation6 + $0x1], 1 }
 0x3fc   :  { %1637 = vsyncpa [#allocation9], 1 }
 0x3fd   :  { %1638 = vsyncpa [#allocation12], 1 }
 0x3fe   :  { %1639 = vsyncpa [#allocation4], 1 }
 0x3ff   :  { %1641 = vsyncpa [#allocation4 + $0x1], 1 }

</bundles_post_ra>
